<compile_context>
chip_gen: v7x
topology: tpu7x:2x2x1
jax: 0.10.0
libtpu: 0.0.40
codegen_flags: <defaults>
</compile_context>

<pallas_src>
import functools

import jax
import jax.numpy as jnp
from jax.experimental import pallas as pl
from jax.experimental.pallas import tpu as pltpu


_FUSED_MAX_N = 1024                 # n_pad at/below this -> fused per-layer call
_XW_RESIDENT_MAX_BYTES = 8 << 20    # keep XW' VMEM-resident up to this size


def _round_up(x, m):
    return ((x + m - 1) // m) * m


def _largest_tile(n_pad, cap, min_tiles=1):
    """Largest multiple of 128 dividing n_pad, <= cap, leaving >= min_tiles tiles."""
    best, t = 128, 128
    top = min(cap, n_pad)
    while t <= top:
        if n_pad % t == 0 and n_pad // t >= min_tiles:
            best = t
        t += 128
    return best


def _vmem_limit(nbytes):
    """Scoped-VMEM budget: 2x headroom for compiler temporaries, >=16MiB, <=40MiB."""
    return int(min(max(2 * nbytes + (4 << 20), 16 << 20), 40 << 20))


# ---------------------------------------------------------------------------
# Fused layer kernel (small graphs): everything VMEM resident, 2 row tiles.
#   out = act( dinv_row * ((A+I)_rows @ (dinv_all * (X @ W))) + b )
# ---------------------------------------------------------------------------
def _fused_layer_kernel(a_ref, x_ref, w_ref, dinv_all_ref, dinv_row_ref, b_ref,
                        o_ref, *, apply_relu):
    xw = jnp.dot(x_ref[...], w_ref[...], preferred_element_type=jnp.float32)
    xw = (dinv_all_ref[...] * xw).astype(jnp.bfloat16)
    # int8 {0,1} adjacency -> bf16 for the MXU (two-step cast for portability).
    a = a_ref[...].astype(jnp.float32).astype(jnp.bfloat16)
    agg = jnp.dot(a, xw, preferred_element_type=jnp.float32)
    h = dinv_row_ref[...] * agg + b_ref[...]
    if apply_relu:
        h = jnp.maximum(h, 0.0)
    o_ref[...] = h.astype(o_ref.dtype)


# ---------------------------------------------------------------------------
# General path kernel 1: projection  XW' = dinv * (X @ W)   (once per layer)
# ---------------------------------------------------------------------------
def _project_kernel(x_ref, w_ref, dinv_ref, o_ref):
    xw = jnp.dot(x_ref[...], w_ref[...], preferred_element_type=jnp.float32)
    o_ref[...] = (dinv_ref[...] * xw).astype(o_ref.dtype)


# ---------------------------------------------------------------------------
# General path kernel 2: aggregation  H = act(dinv * ((A+I) @ XW') + b)
# XW' is kept fully VMEM-resident (constant index_map) and sliced in-kernel.
# ---------------------------------------------------------------------------
def _aggregate_kernel(a_ref, xw_ref, dinv_ref, b_ref, o_ref, acc_ref, *,
                      tile_k, xw_resident, apply_relu):
    k = pl.program_id(1)

    @pl.when(k == 0)
    def _():
        acc_ref[...] = jnp.zeros_like(acc_ref)

    if xw_resident:
        off = pl.multiple_of(k * tile_k, 128)
        xw = xw_ref[pl.ds(off, tile_k), :]
    else:
        xw = xw_ref[...]
    a = a_ref[...].astype(jnp.float32).astype(jnp.bfloat16)   # int8 0/1 -> bf16
    acc_ref[...] += jnp.dot(a, xw, preferred_element_type=jnp.float32)

    @pl.when(k == pl.num_programs(1) - 1)
    def _():
        h = dinv_ref[...] * acc_ref[...] + b_ref[...]
        if apply_relu:
            h = jnp.maximum(h, 0.0)
        o_ref[...] = h.astype(o_ref.dtype)


# ---------------------------------------------------------------------------
# Layer wrappers
# ---------------------------------------------------------------------------
def _gcn_layer_fused(a_pad, dinv, h, w, b, *, apply_relu, out_dtype):
    n_pad = a_pad.shape[0]
    f_in = h.shape[1]
    f_out = w.shape[1]
    tile_n = n_pad // 2          # 2 row tiles -> both v7x TensorCores get work
    n_row = n_pad // tile_n
    out_isz = jnp.dtype(out_dtype).itemsize

    vmem_need = (2 * tile_n * n_pad               # A+I (int8, double buffered)
                 + n_pad * f_in * 2               # X (resident)
                 + f_in * f_out * 2               # W (resident)
                 + n_pad * 4 + 2 * tile_n * 4 + f_out * 4
                 + 2 * tile_n * f_out * out_isz   # output (double buffered)
                 + n_pad * f_out * 6              # XW f32 + bf16 temporaries
                 + tile_n * n_pad * 6)            # A cast temporaries

    kernel = functools.partial(_fused_layer_kernel, apply_relu=apply_relu)
    return pl.pallas_call(
        kernel,
        out_shape=jax.ShapeDtypeStruct((n_pad, f_out), out_dtype),
        grid=(n_row,),
        in_specs=[
            pl.BlockSpec((tile_n, n_pad), lambda i: (i, 0)),   # (A+I) row block
            pl.BlockSpec((n_pad, f_in), lambda i: (0, 0)),     # X     (resident)
            pl.BlockSpec((f_in, f_out), lambda i: (0, 0)),     # W     (resident)
            pl.BlockSpec((n_pad, 1), lambda i: (0, 0)),        # dinv  (all rows)
            pl.BlockSpec((tile_n, 1), lambda i: (i, 0)),       # dinv  (row tile)
            pl.BlockSpec((1, f_out), lambda i: (0, 0)),        # bias
        ],
        out_specs=pl.BlockSpec((tile_n, f_out), lambda i: (i, 0)),
        compiler_params=pltpu.CompilerParams(
            dimension_semantics=("parallel",),
            vmem_limit_bytes=_vmem_limit(vmem_need)),
        cost_estimate=pl.CostEstimate(
            flops=2 * n_pad * n_pad * f_out + n_row * 2 * n_pad * f_in * f_out,
            transcendentals=0,
            bytes_accessed=(n_pad * n_pad + n_pad * f_in * 2 + f_in * f_out * 2
                            + n_pad * 4 + f_out * 4 + n_pad * f_out * out_isz)),
    )(a_pad, h, w, dinv, dinv, b)


def _gcn_layer_general(a_pad, dinv, h, w, b, *, apply_relu, out_dtype):
    n_pad = a_pad.shape[0]
    f_in = h.shape[1]
    f_out = w.shape[1]
    out_isz = jnp.dtype(out_dtype).itemsize

    tile_n = _largest_tile(n_pad, 512, min_tiles=2)   # >=2 row tiles (v7x 2 TCs)
    tile_k = _largest_tile(n_pad, 2048, min_tiles=1)
    n_row = n_pad // tile_n
    n_k = n_pad // tile_k

    # ---- projection: XW' = dinv * (H @ W), computed exactly once -----------
    proj_vmem = (2 * tile_n * f_in * 2 + f_in * f_out * 2 + 2 * tile_n * 4
                 + 2 * tile_n * f_out * 2 + tile_n * f_out * 4)
    xw = pl.pallas_call(
        _project_kernel,
        out_shape=jax.ShapeDtypeStruct((n_pad, f_out), jnp.bfloat16),
        grid=(n_row,),
        in_specs=[
            pl.BlockSpec((tile_n, f_in), lambda i: (i, 0)),
            pl.BlockSpec((f_in, f_out), lambda i: (0, 0)),     # W (resident)
            pl.BlockSpec((tile_n, 1), lambda i: (i, 0)),
        ],
        out_specs=pl.BlockSpec((tile_n, f_out), lambda i: (i, 0)),
        compiler_params=pltpu.CompilerParams(
            dimension_semantics=("parallel",),
            vmem_limit_bytes=_vmem_limit(proj_vmem)),
        cost_estimate=pl.CostEstimate(
            flops=2 * n_pad * f_in * f_out,
            transcendentals=0,
            bytes_accessed=(n_pad * f_in * 2 + f_in * f_out * 2 + n_pad * 4
                            + n_pad * f_out * 2)),
    )(h, w, dinv)

    # ---- aggregation: H = act(dinv * ((A+I) @ XW') + b) --------------------
    xw_bytes = n_pad * f_out * 2
    xw_resident = xw_bytes <= _XW_RESIDENT_MAX_BYTES
    if xw_resident:
        xw_spec = pl.BlockSpec((n_pad, f_out), lambda i, k: (0, 0))   # resident
        xw_read = xw_bytes
    else:
        xw_spec = pl.BlockSpec((tile_k, f_out), lambda i, k: (k, 0))  # streamed
        xw_read = n_row * n_pad * f_out * 2

    agg_vmem = (2 * tile_n * tile_k                                   # A int8
                + (xw_bytes if xw_resident else 2 * tile_k * f_out * 2)
                + 2 * tile_n * 4 + f_out * 4
                + tile_n * f_out * 4                                  # acc
                + 2 * tile_n * f_out * out_isz
                + tile_n * tile_k * 6)                                # cast tmp

    kernel = functools.partial(_aggregate_kernel, tile_k=tile_k,
                               xw_resident=xw_resident, apply_relu=apply_relu)
    return pl.pallas_call(
        kernel,
        out_shape=jax.ShapeDtypeStruct((n_pad, f_out), out_dtype),
        grid=(n_row, n_k),
        in_specs=[
            pl.BlockSpec((tile_n, tile_k), lambda i, k: (i, k)),   # (A+I) int8
            xw_spec,
            pl.BlockSpec((tile_n, 1), lambda i, k: (i, 0)),        # dinv row
            pl.BlockSpec((1, f_out), lambda i, k: (0, 0)),         # bias
        ],
        out_specs=pl.BlockSpec((tile_n, f_out), lambda i, k: (i, 0)),
        scratch_shapes=[pltpu.VMEM((tile_n, f_out), jnp.float32)],
        compiler_params=pltpu.CompilerParams(
            dimension_semantics=("parallel", "arbitrary"),
            vmem_limit_bytes=_vmem_limit(agg_vmem)),
        cost_estimate=pl.CostEstimate(
            flops=2 * n_pad * n_pad * f_out,
            transcendentals=0,
            bytes_accessed=(n_pad * n_pad + xw_read + n_pad * 4 + f_out * 4
                            + n_pad * f_out * out_isz)),
    )(a_pad, xw, dinv, b)


def gcn_layer(a_pad, dinv, h, w, b, *, apply_relu, out_dtype):
    if a_pad.shape[0] <= _FUSED_MAX_N:
        return _gcn_layer_fused(a_pad, dinv, h, w, b,
                                apply_relu=apply_relu, out_dtype=out_dtype)
    return _gcn_layer_general(a_pad, dinv, h, w, b,
                              apply_relu=apply_relu, out_dtype=out_dtype)


@jax.jit
def gcn_forward_padded(a_pad, dinv_pad, feat_pad, params_padded):
    """Padded forward: h = features; for layer in layers: h = layer(g, h).

    Invariant: padded rows (i >= N) of hidden activations equal ReLU(b) (their
    adjacency row is all-zero), but they can never contaminate real rows
    because their d_inv_sqrt entry is 0, which zeroes their XW' contribution.
    """
    h = feat_pad
    last = len(params_padded) - 1
    for i, (w, b) in enumerate(params_padded):
        is_last = i == last
        h = gcn_layer(a_pad, dinv_pad, h, w, b,
                      apply_relu=not is_last,
                      out_dtype=jnp.float32 if is_last else jnp.bfloat16)
    return h


# ---------------------------------------------------------------------------
# One-time preparation (per graph / per parameter set) + convenience wrapper
# ---------------------------------------------------------------------------
def prepare_graph(adj01):
    """adj01: dense {0,1} adjacency (N, N), self-loops already included.
    Returns (padded int8 (A+I), padded f32 d_inv_sqrt column).  Built once."""
    n = adj01.shape[0]
    n_pad = _round_up(n, 128)
    deg = adj01.astype(jnp.float32).sum(axis=1)
    dinv = jnp.where(deg > 0.0, 1.0 / jnp.sqrt(jnp.maximum(deg, 1e-12)), 0.0)
    a_pad = jnp.zeros((n_pad, n_pad), jnp.int8)
    a_pad = a_pad.at[:n, :n].set(adj01.astype(jnp.int8))
    dinv_pad = jnp.zeros((n_pad, 1), jnp.float32)
    dinv_pad = dinv_pad.at[:n, 0].set(dinv)
    return a_pad, dinv_pad


def prepare_params(params):
    """Pad feature dims to multiples of 128 and cast weights to bf16, once."""
    padded = []
    for w, b in params:
        fi, fo = w.shape
        fi_p, fo_p = _round_up(fi, 128), _round_up(fo, 128)
        w_p = jnp.zeros((fi_p, fo_p), jnp.bfloat16)
        w_p = w_p.at[:fi, :fo].set(w.astype(jnp.bfloat16))
        b_p = jnp.zeros((1, fo_p), jnp.float32)
        b_p = b_p.at[:, :fo].set(jnp.asarray(b, jnp.float32).reshape(1, fo))
        padded.append((w_p, b_p))
    return padded


def pad_features(features, n_pad):
    n, f = features.shape
    f_pad = _round_up(f, 128)
    out = jnp.zeros((n_pad, f_pad), jnp.bfloat16)
    return out.at[:n, :f].set(features.astype(jnp.bfloat16))


def gcn_forward(adj01, features, params):
    """Convenience wrapper matching GCN.forward(g, features)."""
    a_pad, dinv_pad = prepare_graph(adj01)
    params_p = prepare_params(params)
    feat_pad = pad_features(features, a_pad.shape[0])
    out = gcn_forward_padded(a_pad, dinv_pad, feat_pad, params_p)
    return out[:adj01.shape[0], :params[-1][0].shape[1]]


def init_gcn_params(key, in_feats, n_hidden, n_classes, n_layers):
    """Glorot-uniform weights / zero biases, matching GraphConv layer shapes."""
    dims = [in_feats] + [n_hidden] * n_layers + [n_classes]
    params = []
    for i in range(len(dims) - 1):
        key, wk = jax.random.split(key)
        fan_in, fan_out = dims[i], dims[i + 1]
        limit = (6.0 / (fan_in + fan_out)) ** 0.5
        w = jax.random.uniform(wk, (fan_in, fan_out), jnp.float32, -limit, limit)
        b = jnp.zeros((1, fan_out), jnp.float32)
        params.append((w, b))
    return params


def ref_forward(adj01, features, params):
    """Pure-JAX reference mirroring the kernel's precision choices."""
    deg = adj01.astype(jnp.float32).sum(axis=1)
    dinv = jnp.where(deg > 0.0, 1.0 / jnp.sqrt(jnp.maximum(deg, 1e-12)), 0.0)
    dinv = dinv[:, None]
    a = adj01.astype(jnp.float32)
    h = features.astype(jnp.bfloat16).astype(jnp.float32)
    for j, (w, b) in enumerate(params):
        wb = w.astype(jnp.bfloat16).astype(jnp.float32)
        xw = (dinv * (h @ wb)).astype(jnp.bfloat16).astype(jnp.float32)
        h = dinv * (a @ xw) + b.reshape(1, -1)
        if j < len(params) - 1:
            h = jnp.maximum(h, 0.0).astype(jnp.bfloat16).astype(jnp.float32)
    return h


# TODO(synk): the `dropout` ctor arg is never used in the reference forward,
# so it is intentionally not implemented.


if __name__ == "__main__":
    def run_case(name, n, in_feats, n_hidden, n_classes, n_layers, p_edge, key):
        key, ka, kx, kp = jax.random.split(key, 4)
        adj = (jax.random.uniform(ka, (n, n)) < p_edge).astype(jnp.float32)
        adj = jnp.maximum(adj, adj.T)
        adj = jnp.minimum(adj + jnp.eye(n, dtype=jnp.float32), 1.0)  # self loops
        features = jax.random.normal(kx, (n, in_feats), dtype=jnp.float32)
        params = init_gcn_params(kp, in_feats, n_hidden, n_classes, n_layers)

        # Graph + params prepared once; the forward itself is jitted.
        a_pad, dinv_pad = prepare_graph(adj)
        params_p = prepare_params(params)
        feat_pad = pad_features(features, a_pad.shape[0])

        out_pad = gcn_forward_padded(a_pad, dinv_pad, feat_pad, params_p)
        out_pad = jax.block_until_ready(out_pad)
        out = out_pad[:n, :n_classes]
        assert out.shape == (n, n_classes)
        assert bool(jnp.all(jnp.isfinite(out)))

        ref = ref_forward(adj, features, params)
        max_err = float(jnp.max(jnp.abs(out - ref)))
        assert max_err < 5e-2, f"{name}: mismatch vs reference: {max_err}"
        return key

    key = jax.random.PRNGKey(0)
    # Small graph -> fused single-call-per-layer path (n_pad = 128, 2 row tiles).
    key = run_case("small", 32, 16, 32, 8, 2, 0.2, key)
    # Larger graph -> two-call path (int8 A streaming, VMEM-resident XW).
    key = run_case("medium", 1200, 64, 128, 16, 1, 0.01, key)

    print("KERNEL_OK")
</pallas_src>

<mosaic_0001>
module attributes {stable_mosaic.version = 11 : i64} {
  func.func @_fused_layer_kernel(%arg0: i32, %arg1: memref<64x128xi8, #tpu.memory_space<vmem>>, %arg2: memref<128x128xbf16, #tpu.memory_space<vmem>>, %arg3: memref<128x128xbf16, #tpu.memory_space<vmem>>, %arg4: memref<128x1xf32, #tpu.memory_space<vmem>>, %arg5: memref<64x1xf32, #tpu.memory_space<vmem>>, %arg6: memref<1x128xf32, #tpu.memory_space<vmem>>, %arg7: memref<64x128xbf16, #tpu.memory_space<vmem>>) attributes {dimension_semantics = [#tpu.dimension_semantics<parallel>], iteration_bounds = array<i64: 2>, scalar_prefetch = 0 : i64, scratch_operands = 0 : i64, tpu.core_type = #tpu.core_type<tc>, window_params = [{transform_indices = @transform_0, window_bounds = array<i64: 64, 128>}, {pipeline_mode = #tpu.pipeline_mode<synchronous>, transform_indices = @transform_1, window_bounds = array<i64: 128, 128>}, {pipeline_mode = #tpu.pipeline_mode<synchronous>, transform_indices = @transform_2, window_bounds = array<i64: 128, 128>}, {pipeline_mode = #tpu.pipeline_mode<synchronous>, transform_indices = @transform_3, window_bounds = array<i64: 128, 1>}, {transform_indices = @transform_4, window_bounds = array<i64: 64, 1>}, {pipeline_mode = #tpu.pipeline_mode<synchronous>, transform_indices = @transform_5, window_bounds = array<i64: 1, 128>}, {transform_indices = @transform_6, window_bounds = array<i64: 64, 128>}]} {
    %c0 = arith.constant 0 : index
    %c0_0 = arith.constant 0 : index
    %0 = vector.load %arg2[%c0, %c0_0] : memref<128x128xbf16, #tpu.memory_space<vmem>>, vector<128x128xbf16>
    %c0_1 = arith.constant 0 : index
    %c0_2 = arith.constant 0 : index
    %1 = vector.load %arg3[%c0_1, %c0_2] : memref<128x128xbf16, #tpu.memory_space<vmem>>, vector<128x128xbf16>
    %cst = arith.constant dense<0.000000e+00> : vector<128x128xf32>
    %2 = tpu.matmul %0, %1, %cst {dimension_numbers = #tpu.dot_dimension_numbers<[1], [0], [0], [1], [0, 0, 1, 1], [], []>} : vector<128x128xbf16>, vector<128x128xbf16>, vector<128x128xf32> -> vector<128x128xf32>
    %c0_3 = arith.constant 0 : index
    %c0_4 = arith.constant 0 : index
    %3 = vector.load %arg4[%c0_3, %c0_4] : memref<128x1xf32, #tpu.memory_space<vmem>>, vector<128x1xf32>
    %4 = vector.broadcast %3 : vector<128x1xf32> to vector<128x128xf32>
    %5 = arith.mulf %4, %2 : vector<128x128xf32>
    %6 = arith.truncf %5 : vector<128x128xf32> to vector<128x128xbf16>
    %c0_5 = arith.constant 0 : index
    %c0_6 = arith.constant 0 : index
    %7 = vector.load %arg1[%c0_5, %c0_6] : memref<64x128xi8, #tpu.memory_space<vmem>>, vector<64x128xi8>
    %8 = arith.sitofp %7 : vector<64x128xi8> to vector<64x128xf32>
    %9 = arith.truncf %8 : vector<64x128xf32> to vector<64x128xbf16>
    %cst_7 = arith.constant dense<0.000000e+00> : vector<64x128xf32>
    %10 = tpu.matmul %9, %6, %cst_7 {dimension_numbers = #tpu.dot_dimension_numbers<[1], [0], [0], [1], [0, 0, 1, 1], [], []>} : vector<64x128xbf16>, vector<128x128xbf16>, vector<64x128xf32> -> vector<64x128xf32>
    %c0_8 = arith.constant 0 : index
    %c0_9 = arith.constant 0 : index
    %11 = vector.load %arg5[%c0_8, %c0_9] : memref<64x1xf32, #tpu.memory_space<vmem>>, vector<64x1xf32>
    %12 = vector.broadcast %11 : vector<64x1xf32> to vector<64x128xf32>
    %13 = arith.mulf %12, %10 : vector<64x128xf32>
    %c0_10 = arith.constant 0 : index
    %c0_11 = arith.constant 0 : index
    %14 = vector.load %arg6[%c0_10, %c0_11] : memref<1x128xf32, #tpu.memory_space<vmem>>, vector<1x128xf32>
    %15 = vector.broadcast %14 : vector<1x128xf32> to vector<64x128xf32>
    %16 = arith.addf %13, %15 : vector<64x128xf32>
    %cst_12 = arith.constant 0.000000e+00 : f32
    %17 = vector.broadcast %cst_12 : f32 to vector<64x128xf32>
    %18 = arith.maximumf %16, %17 : vector<64x128xf32>
    %19 = arith.truncf %18 : vector<64x128xf32> to vector<64x128xbf16>
    %c0_13 = arith.constant 0 : index
    %c0_14 = arith.constant 0 : index
    %20 = vector.load %arg7[%c0_13, %c0_14] : memref<64x128xbf16, #tpu.memory_space<vmem>>, vector<64x128xbf16>
    tpu.vector_store %arg7[%c0_13, %c0_14], %19 {strides = array<i32>} : memref<64x128xbf16, #tpu.memory_space<vmem>>, vector<64x128xbf16>,
    return
  }
  func.func @transform_0(%arg0: i32) -> (i32, i32) {
    %c0_i32 = arith.constant 0 : i32
    %c0_i32_0 = arith.constant 0 : i32
    return %arg0, %c0_i32 : i32, i32
  }
  func.func @transform_1(%arg0: i32) -> (i32, i32) {
    %c0_i32 = arith.constant 0 : i32
    %c0_i32_0 = arith.constant 0 : i32
    %c0_i32_1 = arith.constant 0 : i32
    return %c0_i32, %c0_i32_0 : i32, i32
  }
  func.func @transform_2(%arg0: i32) -> (i32, i32) {
    %c0_i32 = arith.constant 0 : i32
    %c0_i32_0 = arith.constant 0 : i32
    %c0_i32_1 = arith.constant 0 : i32
    return %c0_i32, %c0_i32_0 : i32, i32
  }
  func.func @transform_3(%arg0: i32) -> (i32, i32) {
    %c0_i32 = arith.constant 0 : i32
    %c0_i32_0 = arith.constant 0 : i32
    %c0_i32_1 = arith.constant 0 : i32
    return %c0_i32, %c0_i32_0 : i32, i32
  }
  func.func @transform_4(%arg0: i32) -> (i32, i32) {
    %c0_i32 = arith.constant 0 : i32
    %c0_i32_0 = arith.constant 0 : i32
    return %arg0, %c0_i32 : i32, i32
  }
  func.func @transform_5(%arg0: i32) -> (i32, i32) {
    %c0_i32 = arith.constant 0 : i32
    %c0_i32_0 = arith.constant 0 : i32
    %c0_i32_1 = arith.constant 0 : i32
    return %c0_i32, %c0_i32_0 : i32, i32
  }
  func.func @transform_6(%arg0: i32) -> (i32, i32) {
    %c0_i32 = arith.constant 0 : i32
    %c0_i32_0 = arith.constant 0 : i32
    return %arg0, %c0_i32 : i32, i32
  }
}

module attributes {stable_mosaic.version = 11 : i64} {
  func.func @_fused_layer_kernel(%arg0: i32, %arg1: memref<64x128xi8, #tpu.memory_space<vmem>>, %arg2: memref<128x128xbf16, #tpu.memory_space<vmem>>, %arg3: memref<128x128xbf16, #tpu.memory_space<vmem>>, %arg4: memref<128x1xf32, #tpu.memory_space<vmem>>, %arg5: memref<64x1xf32, #tpu.memory_space<vmem>>, %arg6: memref<1x128xf32, #tpu.memory_space<vmem>>, %arg7: memref<64x128xf32, #tpu.memory_space<vmem>>) attributes {dimension_semantics = [#tpu.dimension_semantics<parallel>], iteration_bounds = array<i64: 2>, scalar_prefetch = 0 : i64, scratch_operands = 0 : i64, tpu.core_type = #tpu.core_type<tc>, window_params = [{transform_indices = @transform_0, window_bounds = array<i64: 64, 128>}, {pipeline_mode = #tpu.pipeline_mode<synchronous>, transform_indices = @transform_1, window_bounds = array<i64: 128, 128>}, {pipeline_mode = #tpu.pipeline_mode<synchronous>, transform_indices = @transform_2, window_bounds = array<i64: 128, 128>}, {pipeline_mode = #tpu.pipeline_mode<synchronous>, transform_indices = @transform_3, window_bounds = array<i64: 128, 1>}, {transform_indices = @transform_4, window_bounds = array<i64: 64, 1>}, {pipeline_mode = #tpu.pipeline_mode<synchronous>, transform_indices = @transform_5, window_bounds = array<i64: 1, 128>}, {transform_indices = @transform_6, window_bounds = array<i64: 64, 128>}]} {
    %c0 = arith.constant 0 : index
    %c0_0 = arith.constant 0 : index
    %0 = vector.load %arg2[%c0, %c0_0] : memref<128x128xbf16, #tpu.memory_space<vmem>>, vector<128x128xbf16>
    %c0_1 = arith.constant 0 : index
    %c0_2 = arith.constant 0 : index
    %1 = vector.load %arg3[%c0_1, %c0_2] : memref<128x128xbf16, #tpu.memory_space<vmem>>, vector<128x128xbf16>
    %cst = arith.constant dense<0.000000e+00> : vector<128x128xf32>
    %2 = tpu.matmul %0, %1, %cst {dimension_numbers = #tpu.dot_dimension_numbers<[1], [0], [0], [1], [0, 0, 1, 1], [], []>} : vector<128x128xbf16>, vector<128x128xbf16>, vector<128x128xf32> -> vector<128x128xf32>
    %c0_3 = arith.constant 0 : index
    %c0_4 = arith.constant 0 : index
    %3 = vector.load %arg4[%c0_3, %c0_4] : memref<128x1xf32, #tpu.memory_space<vmem>>, vector<128x1xf32>
    %4 = vector.broadcast %3 : vector<128x1xf32> to vector<128x128xf32>
    %5 = arith.mulf %4, %2 : vector<128x128xf32>
    %6 = arith.truncf %5 : vector<128x128xf32> to vector<128x128xbf16>
    %c0_5 = arith.constant 0 : index
    %c0_6 = arith.constant 0 : index
    %7 = vector.load %arg1[%c0_5, %c0_6] : memref<64x128xi8, #tpu.memory_space<vmem>>, vector<64x128xi8>
    %8 = arith.sitofp %7 : vector<64x128xi8> to vector<64x128xf32>
    %9 = arith.truncf %8 : vector<64x128xf32> to vector<64x128xbf16>
    %cst_7 = arith.constant dense<0.000000e+00> : vector<64x128xf32>
    %10 = tpu.matmul %9, %6, %cst_7 {dimension_numbers = #tpu.dot_dimension_numbers<[1], [0], [0], [1], [0, 0, 1, 1], [], []>} : vector<64x128xbf16>, vector<128x128xbf16>, vector<64x128xf32> -> vector<64x128xf32>
    %c0_8 = arith.constant 0 : index
    %c0_9 = arith.constant 0 : index
    %11 = vector.load %arg5[%c0_8, %c0_9] : memref<64x1xf32, #tpu.memory_space<vmem>>, vector<64x1xf32>
    %12 = vector.broadcast %11 : vector<64x1xf32> to vector<64x128xf32>
    %13 = arith.mulf %12, %10 : vector<64x128xf32>
    %c0_10 = arith.constant 0 : index
    %c0_11 = arith.constant 0 : index
    %14 = vector.load %arg6[%c0_10, %c0_11] : memref<1x128xf32, #tpu.memory_space<vmem>>, vector<1x128xf32>
    %15 = vector.broadcast %14 : vector<1x128xf32> to vector<64x128xf32>
    %16 = arith.addf %13, %15 : vector<64x128xf32>
    %c0_12 = arith.constant 0 : index
    %c0_13 = arith.constant 0 : index
    %17 = vector.load %arg7[%c0_12, %c0_13] : memref<64x128xf32, #tpu.memory_space<vmem>>, vector<64x128xf32>
    tpu.vector_store %arg7[%c0_12, %c0_13], %16 {strides = array<i32>} : memref<64x128xf32, #tpu.memory_space<vmem>>, vector<64x128xf32>,
    return
  }
  func.func @transform_0(%arg0: i32) -> (i32, i32) {
    %c0_i32 = arith.constant 0 : i32
    %c0_i32_0 = arith.constant 0 : i32
    return %arg0, %c0_i32 : i32, i32
  }
  func.func @transform_1(%arg0: i32) -> (i32, i32) {
    %c0_i32 = arith.constant 0 : i32
    %c0_i32_0 = arith.constant 0 : i32
    %c0_i32_1 = arith.constant 0 : i32
    return %c0_i32, %c0_i32_0 : i32, i32
  }
  func.func @transform_2(%arg0: i32) -> (i32, i32) {
    %c0_i32 = arith.constant 0 : i32
    %c0_i32_0 = arith.constant 0 : i32
    %c0_i32_1 = arith.constant 0 : i32
    return %c0_i32, %c0_i32_0 : i32, i32
  }
  func.func @transform_3(%arg0: i32) -> (i32, i32) {
    %c0_i32 = arith.constant 0 : i32
    %c0_i32_0 = arith.constant 0 : i32
    %c0_i32_1 = arith.constant 0 : i32
    return %c0_i32, %c0_i32_0 : i32, i32
  }
  func.func @transform_4(%arg0: i32) -> (i32, i32) {
    %c0_i32 = arith.constant 0 : i32
    %c0_i32_0 = arith.constant 0 : i32
    return %arg0, %c0_i32 : i32, i32
  }
  func.func @transform_5(%arg0: i32) -> (i32, i32) {
    %c0_i32 = arith.constant 0 : i32
    %c0_i32_0 = arith.constant 0 : i32
    %c0_i32_1 = arith.constant 0 : i32
    return %c0_i32, %c0_i32_0 : i32, i32
  }
  func.func @transform_6(%arg0: i32) -> (i32, i32) {
    %c0_i32 = arith.constant 0 : i32
    %c0_i32_0 = arith.constant 0 : i32
    return %arg0, %c0_i32 : i32, i32
  }
}

module attributes {stable_mosaic.version = 11 : i64} {
  func.func @_fused_layer_kernel(%arg0: i32, %arg1: memref<64x128xi8, #tpu.memory_space<vmem>>, %arg2: memref<128x128xbf16, #tpu.memory_space<vmem>>, %arg3: memref<128x128xbf16, #tpu.memory_space<vmem>>, %arg4: memref<128x1xf32, #tpu.memory_space<vmem>>, %arg5: memref<64x1xf32, #tpu.memory_space<vmem>>, %arg6: memref<1x128xf32, #tpu.memory_space<vmem>>, %arg7: memref<64x128xbf16, #tpu.memory_space<vmem>>) attributes {dimension_semantics = [#tpu.dimension_semantics<parallel>], iteration_bounds = array<i64: 2>, scalar_prefetch = 0 : i64, scratch_operands = 0 : i64, tpu.core_type = #tpu.core_type<tc>, window_params = [{transform_indices = @transform_0, window_bounds = array<i64: 64, 128>}, {pipeline_mode = #tpu.pipeline_mode<synchronous>, transform_indices = @transform_1, window_bounds = array<i64: 128, 128>}, {pipeline_mode = #tpu.pipeline_mode<synchronous>, transform_indices = @transform_2, window_bounds = array<i64: 128, 128>}, {pipeline_mode = #tpu.pipeline_mode<synchronous>, transform_indices = @transform_3, window_bounds = array<i64: 128, 1>}, {transform_indices = @transform_4, window_bounds = array<i64: 64, 1>}, {pipeline_mode = #tpu.pipeline_mode<synchronous>, transform_indices = @transform_5, window_bounds = array<i64: 1, 128>}, {transform_indices = @transform_6, window_bounds = array<i64: 64, 128>}]} {
    %c0 = arith.constant 0 : index
    %c0_0 = arith.constant 0 : index
    %0 = vector.load %arg2[%c0, %c0_0] : memref<128x128xbf16, #tpu.memory_space<vmem>>, vector<128x128xbf16>
    %c0_1 = arith.constant 0 : index
    %c0_2 = arith.constant 0 : index
    %1 = vector.load %arg3[%c0_1, %c0_2] : memref<128x128xbf16, #tpu.memory_space<vmem>>, vector<128x128xbf16>
    %cst = arith.constant dense<0.000000e+00> : vector<128x128xf32>
    %2 = tpu.matmul %0, %1, %cst {dimension_numbers = #tpu.dot_dimension_numbers<[1], [0], [0], [1], [0, 0, 1, 1], [], []>} : vector<128x128xbf16>, vector<128x128xbf16>, vector<128x128xf32> -> vector<128x128xf32>
    %c0_3 = arith.constant 0 : index
    %c0_4 = arith.constant 0 : index
    %3 = vector.load %arg4[%c0_3, %c0_4] : memref<128x1xf32, #tpu.memory_space<vmem>>, vector<128x1xf32>
    %4 = vector.broadcast %3 : vector<128x1xf32> to vector<128x128xf32>
    %5 = arith.mulf %4, %2 : vector<128x128xf32>
    %6 = arith.truncf %5 : vector<128x128xf32> to vector<128x128xbf16>
    %c0_5 = arith.constant 0 : index
    %c0_6 = arith.constant 0 : index
    %7 = vector.load %arg1[%c0_5, %c0_6] : memref<64x128xi8, #tpu.memory_space<vmem>>, vector<64x128xi8>
    %8 = arith.sitofp %7 : vector<64x128xi8> to vector<64x128xf32>
    %9 = arith.truncf %8 : vector<64x128xf32> to vector<64x128xbf16>
    %cst_7 = arith.constant dense<0.000000e+00> : vector<64x128xf32>
    %10 = tpu.matmul %9, %6, %cst_7 {dimension_numbers = #tpu.dot_dimension_numbers<[1], [0], [0], [1], [0, 0, 1, 1], [], []>} : vector<64x128xbf16>, vector<128x128xbf16>, vector<64x128xf32> -> vector<64x128xf32>
    %c0_8 = arith.constant 0 : index
    %c0_9 = arith.constant 0 : index
    %11 = vector.load %arg5[%c0_8, %c0_9] : memref<64x1xf32, #tpu.memory_space<vmem>>, vector<64x1xf32>
    %12 = vector.broadcast %11 : vector<64x1xf32> to vector<64x128xf32>
    %13 = arith.mulf %12, %10 : vector<64x128xf32>
    %c0_10 = arith.constant 0 : index
    %c0_11 = arith.constant 0 : index
    %14 = vector.load %arg6[%c0_10, %c0_11] : memref<1x128xf32, #tpu.memory_space<vmem>>, vector<1x128xf32>
    %15 = vector.broadcast %14 : vector<1x128xf32> to vector<64x128xf32>
    %16 = arith.addf %13, %15 : vector<64x128xf32>
    %cst_12 = arith.constant 0.000000e+00 : f32
    %17 = vector.broadcast %cst_12 : f32 to vector<64x128xf32>
    %18 = arith.maximumf %16, %17 : vector<64x128xf32>
    %19 = arith.truncf %18 : vector<64x128xf32> to vector<64x128xbf16>
    %c0_13 = arith.constant 0 : index
    %c0_14 = arith.constant 0 : index
    %20 = vector.load %arg7[%c0_13, %c0_14] : memref<64x128xbf16, #tpu.memory_space<vmem>>, vector<64x128xbf16>
    tpu.vector_store %arg7[%c0_13, %c0_14], %19 {strides = array<i32>} : memref<64x128xbf16, #tpu.memory_space<vmem>>, vector<64x128xbf16>,
    return
  }
  func.func @transform_0(%arg0: i32) -> (i32, i32) {
    %c0_i32 = arith.constant 0 : i32
    %c0_i32_0 = arith.constant 0 : i32
    return %arg0, %c0_i32 : i32, i32
  }
  func.func @transform_1(%arg0: i32) -> (i32, i32) {
    %c0_i32 = arith.constant 0 : i32
    %c0_i32_0 = arith.constant 0 : i32
    %c0_i32_1 = arith.constant 0 : i32
    return %c0_i32, %c0_i32_0 : i32, i32
  }
  func.func @transform_2(%arg0: i32) -> (i32, i32) {
    %c0_i32 = arith.constant 0 : i32
    %c0_i32_0 = arith.constant 0 : i32
    %c0_i32_1 = arith.constant 0 : i32
    return %c0_i32, %c0_i32_0 : i32, i32
  }
  func.func @transform_3(%arg0: i32) -> (i32, i32) {
    %c0_i32 = arith.constant 0 : i32
    %c0_i32_0 = arith.constant 0 : i32
    %c0_i32_1 = arith.constant 0 : i32
    return %c0_i32, %c0_i32_0 : i32, i32
  }
  func.func @transform_4(%arg0: i32) -> (i32, i32) {
    %c0_i32 = arith.constant 0 : i32
    %c0_i32_0 = arith.constant 0 : i32
    return %arg0, %c0_i32 : i32, i32
  }
  func.func @transform_5(%arg0: i32) -> (i32, i32) {
    %c0_i32 = arith.constant 0 : i32
    %c0_i32_0 = arith.constant 0 : i32
    %c0_i32_1 = arith.constant 0 : i32
    return %c0_i32, %c0_i32_0 : i32, i32
  }
  func.func @transform_6(%arg0: i32) -> (i32, i32) {
    %c0_i32 = arith.constant 0 : i32
    %c0_i32_0 = arith.constant 0 : i32
    return %arg0, %c0_i32 : i32, i32
  }
}

</mosaic_0001>

<bundles_post_ra>
// kernel: gcn_forward_padded.5
= control target key start
LH: loop header
LB: loop body
LE: loop exit
PB: predicated region body
PF: predicated region fallthrough
CT: control target
= control target key end

     0   :  { %11 = vsyncpa [#allocation3], 0  ;;  %s1355_s0 = inlined_call_operand.vmem [shape: s8[128,128], index: 0, kind: input, shape index: {}]   ;;  %s1356_s1 = inlined_call_operand.vmem [shape: bf16[128,128], index: 1, kind: input, shape index: {}]   ;;  %s1357_s2 = inlined_call_operand.vmem [shape: bf16[128,128], index: 2, kind: input, shape index: {}]   ;;  %s1358_s3 = inlined_call_operand.vmem [shape: f32[128,1], index: 3, kind: input, shape index: {}, may-alias: {3,4}]   ;;  %s1359_s4 = inlined_call_operand.vmem [shape: f32[128,1], index: 4, kind: input, shape index: {}, may-alias: {3,4}]   ;;  %s1360_s5 = inlined_call_operand.vmem [shape: f32[1,128], index: 5, kind: input, shape index: {}]   ;;  %s1361_s6 = inlined_call_operand.hbm [shape: f32[128,128], index: 6, kind: output, shape index: {}]  }
   0x1   :  { %13 = vsyncpa [#allocation3 + $0x1], 0  ;;  %s1138_s21 = smov 0   ;;  %s1140_s22 = smov 0  }
   0x2   :  { %s1142_s23 = smov 0   ;;  %s1144_s24 = smov 0  }
   0x3 LB: > { %s1159_s25 = sadd.s32 4294967295, %s1097_s24   ;;  %s859_s26 = sadd.s32 4294967294, %s1097_s24   ;;  %s1097_s24 = sphi %s1144_s24, %s1367_s24   ;;  %s1093_s23 = sphi %s1142_s23, %s1366_s23   ;;  %s1089_s22 = sphi %s1140_s22, %s1365_s22   ;;  %s1085_s21 = sphi %s1138_s21, %s1364_s21  }
   0x4   : > { %s1163_s27 = sadd.s32 1, %s1097_s24   ;;  %s162_s28 = sadd.s32 1, %s1093_s23 }
   0x5   : > { %s159_s29 = ssub.s32 %s1097_s24, %s1163_s27  ;;  %p172_p0 = scmp.ne.s32.totalorder %s1093_s23, %s1089_s22 }
   0x6   : > { %p160_p1 = scmp.eq.s32.totalorder %s159_s29, 0  ;;  %p173_p2 = scmp.eq.s32.totalorder %s1159_s25, 1 }
   0x7   : > { %p178_p3 = scmp.ne.s32.totalorder %s1089_s22, %s1085_s21  ;;  %p179_p4 = scmp.eq.s32.totalorder %s859_s26, 1 }
   0x8   : > { %s1174_s30 = scalar_select %p160_p1, %s1093_s23, %s162_s28  }
   0x9   : > { %p1176_p5 = por %p173_p2, %p172_p0  ;;  %p1180_p6 = por %p179_p4, %p178_p3 }
   0xa   : > { %p862_p7 = scmp.ge.s32.totalorder %s1097_s24, 1  ;;  %p227_p8 = scmp.lt.s32.totalorder %s1097_s24, 3 }
   0xc   : > { %p228_p9 = pnand %p862_p7, %p227_p8 }
   0xd   : > { %v1019_v0 = vld [vmem:[%s1357_s2] sm:$0xff] (!%p228_p9)   ;;  %v1020_v1 = vld [vmem:[%s1357_s2 + $0x8] sm:$0xff] (!%p228_p9)   ;;  %v1099_v2 = vmov (!%p228_p9), 0   ;;  %v1021_v3 = vld [vmem:[%s1357_s2 + $0x10] sm:$0xff] (!%p228_p9)   ;;  %s866_s13 = sshll.u32 (!%p228_p9), %s1159_s25, 3  ;;  %s864_s19 = sshll.u32 (!%p228_p9), %s1159_s25, 1 }
   0xe   : > { %231 = sbr.rel (%p228_p9) target bundleno = 540 (0x21c), region = 44  ;;  %1017 = vset.pattern.permute.xlu0 (!%p228_p9), %v1099_v2  ;;  %1018 = vset.pattern.permute.xlu1 (!%p228_p9), %v1099_v2  ;;  %v1022_v4 = vld [vmem:[%s1357_s2 + $0x18] sm:$0xff] (!%p228_p9)   ;;  %v1027_v5 = vld [vmem:[%s1356_s1] sm:$0xff] (!%p228_p9)   ;;  %v1024_v7 = vld [vmem:[%s1357_s2 + $0x28] sm:$0xff] (!%p228_p9)   ;;  %p269_p10 = scmp.lt.s32.totalorder (!%p228_p9), %s866_s13, 15 }
   0xf   : > { %919 = vmatprep.subr.bf16.mxu0 (!%p228_p9), %v1019_v0  ;;  %935 = vmatprep.mubr.bf16.mxu0 (!%p228_p9), %v1027_v5  ;;  %v1023_v6 = vld [vmem:[%s1357_s2 + $0x20] sm:$0xff] (!%p228_p9)   ;;  %v503_v9 = vld [vmem:[%s1358_s3 + $0x10] sm:$0xff] (!%p228_p9)  ;;  %v502_v10 = vld [vmem:[%s1358_s3 + $0x8] sm:$0xff] (!%p228_p9)  ;;  %p263_p11 = scmp.lt.s32.totalorder (!%p228_p9), %s864_s19, 3  ;;  %s259_s9 = sand.u32 (!%p228_p9), 1, %s1089_s22  }
  0x10   : > { %920 = vmatpush3.bf16.msra.mxu0 (!%p228_p9), %v1019_v0  ;;  %v501_v8 = vld [vmem:[%s1358_s3] sm:$0xff] (!%p228_p9)  ;;  %529 = vperm.xlu1 (!%p228_p9), %1018, %v503_v9   ;;  %v504_v11 = vld [vmem:[%s1358_s3 + $0x18] sm:$0xff] (!%p228_p9)  ;;  %v1025_v12 = vld [vmem:[%s1357_s2 + $0x30] sm:$0xff] (!%p228_p9)   ;;  %s863_s10 = sshll.u32 (!%p228_p9), %s259_s9, 6 }
  0x11   : > { %921 = vmatprep.subr.bf16.mxu0 (!%p228_p9), %v1020_v1  ;;  %519 = vperm.xlu0 (!%p228_p9), %1017, %v501_v8   ;;  %v505_v13 = vld [vmem:[%s1358_s3 + $0x20] sm:$0xff] (!%p228_p9)  ;;  %v506_v14 = vld [vmem:[%s1358_s3 + $0x28] sm:$0xff] (!%p228_p9)  ;;  %v1026_v15 = vld [vmem:[%s1357_s2 + $0x38] sm:$0xff] (!%p228_p9)   ;;  %s261_s14 = scalar_lea.vmem (!%p228_p9), [#allocation2], %s863_s10 }
  0x12   : > { %v507_v16 = vld [vmem:[%s1358_s3 + $0x30] sm:$0xff] (!%p228_p9)  ;;  %v508_v17 = vld [vmem:[%s1358_s3 + $0x38] sm:$0xff] (!%p228_p9)  ;;  %v1028_v18 = vld [vmem:[%s1356_s1 + $0x8] sm:$0xff] (!%p228_p9)   ;;  %s785_s15 = sshll.u32 (!%p228_p9), %s261_s14, 4  ;;  %s1310_s15 = int_to_ptr.vmem [resolvable:$true] %s785_s15 }
  0x13   : > { %v509_v19 = vld [vmem:[%s1358_s3 + $0x40] sm:$0xff] (!%p228_p9)  ;;  %v510_v20 = vld [vmem:[%s1358_s3 + $0x48] sm:$0xff] (!%p228_p9)  ;;  %v1029_v21 = vld [vmem:[%s1356_s1 + $0x10] sm:$0xff] (!%p228_p9)  }
  0x14   : > { %922 = vmatpush3.bf16.msra.mxu0 (!%p228_p9), %v1020_v1  ;;  %534 = vperm.xlu1 (!%p228_p9), %1018, %v504_v11   ;;  %v511_v22 = vld [vmem:[%s1358_s3 + $0x50] sm:$0xff] (!%p228_p9)  ;;  %v512_v23 = vld [vmem:[%s1358_s3 + $0x58] sm:$0xff] (!%p228_p9)  ;;  %v513_v25 = vld [vmem:[%s1358_s3 + $0x60] sm:$0xff] (!%p228_p9) }
  0x15   : > { %923 = vmatprep.subr.bf16.mxu0 %v1021_v3  ;;  %524 = vperm.xlu0 %1017, %v502_v10   ;;  %s1369_s13 = smov (!%p269_p10, %s866_s13), 15  ;;  %v1030_v24 = vld [vmem:[%s1356_s1 + $0x18] sm:$0xff]   ;;  %v514_v26 = vld [vmem:[%s1358_s3 + $0x68] sm:$0xff]  ;;  %v1031_v27 = vld [vmem:[%s1356_s1 + $0x20] sm:$0xff]   ;;  %s1371_s19 = smov (!%p263_p11, %s864_s19), 3 }
  0x16   : > { %s867_s20 = sshll.u32 %s1369_s13, 3  ;;  %v515_v28 = vld [vmem:[%s1358_s3 + $0x70] sm:$0xff]  ;;  %v516_v29 = vld [vmem:[%s1358_s3 + $0x78] sm:$0xff]  ;;  %v1032_v30 = vld [vmem:[%s1356_s1 + $0x28] sm:$0xff]   ;;  %s890_s13 = sshll.u32 %s1159_s25, 10 }
  0x17   : > { %s272_s12 = scalar_lea.vmem %s1359_s4, %s867_s20  ;;  %v1033_v33 = vld [vmem:[%s1356_s1 + $0x30] sm:$0xff]   ;;  %v1034_v36 = vld [vmem:[%s1356_s1 + $0x38] sm:$0xff]   ;;  %s865_s20 = sshll.u32 %s1371_s19, 3 }
  0x18   : > { %924 = vmatpush3.bf16.msra.mxu0 %v1021_v3  ;;  %544 = vperm.xlu1 %1018, %v506_v14   ;;  %v692_v31 = vld [vmem:[%s272_s12] sm:$0xff]  ;;  %v693_v32 = vld [vmem:[%s272_s12 + $0x8] sm:$0xff]  ;;  %v694_v34 = vld [vmem:[%s272_s12 + $0x10] sm:$0xff]  ;;  %s1290_s29 = scalar_lea.vmem %s1355_s0, %s865_s20  ;;  %s1308_s18 = scalar_lea.hbm %s1361_s6, %s890_s13 }
  0x19   : > { %925 = vmatprep.subr.bf16.mxu0 %v1022_v4  ;;  %539 = vperm.xlu0 %1017, %v505_v13   ;;  %v695_v35 = vld [vmem:[%s272_s12 + $0x18] sm:$0xff]  ;;  %v696_v37 = vld [vmem:[%s272_s12 + $0x20] sm:$0xff]  ;;  %v697_v38 = vld [vmem:[%s272_s12 + $0x28] sm:$0xff]  ;;  %s1314_s25 = scalar_lea.sflag [#allocation3], %s259_s9  ;;  %s1035_s19 = scalar_lea.vmem %s1310_s15, 1024 }
  0x1a   : > { %v698_v39 = vld [vmem:[%s272_s12 + $0x30] sm:$0xff]  ;;  %v699_v40 = vld [vmem:[%s272_s12 + $0x38] sm:$0xff]  ;;  %v1293_v41 = vld [vmem:[%s1290_s29] sm:$0xff]  ;;  %p1036_p12 = scmp.ne.s32.totalorder %s1310_s15, %s1035_s19  ;;  %s1100_s20 = smov [#allocation2]  }
  0x1b   : > { %v623_v42 = vunpack.c.l.s8.bf16 %v1293_v41  ;;  %s1039_s26 = sshll.u32 %s1100_s20, 4  ;;  %s1040_s26 = int_to_ptr.vmem [resolvable:$false] %s1039_s26 }
  0x1c   : > { %926 = vmatpush3.bf16.msra.mxu0 %v1022_v4  ;;  %554 = vperm.xlu1 %1018, %v508_v17   ;;  %p1037_p13 = pnand %p1036_p12, %p1176_p5  ;;  %s1041_s28 = scalar_lea.vmem %s1040_s26, 2048 }
  0x1d   : > { %927 = vmatprep.subr.bf16.mxu0 %v1023_v6  ;;  %549 = vperm.xlu0 %1017, %v507_v16   ;;  %p1042_p1 = scmp.lt.s32.totalorder %s1310_s15, %s1040_s26  ;;  %p1043_p2 = scmp.lt.s32.totalorder %s1041_s28, %s1035_s19 }
  0x1e   : > { %967 = vmatprep.mubr.bf16.mxu1 %v623_v42  ;;  %p1038_p0 = pneg %p1037_p13 }
  0x1f   : > { %p1044_p3 = por %p1043_p2, %p1042_p1 }
  0x20   : > { %928 = vmatpush3.bf16.msra.mxu0 %v1023_v6  ;;  %564 = vperm.xlu1 %1018, %v510_v20  }
  0x21   : > { %929 = vmatprep.subr.bf16.mxu0 %v1024_v7  ;;  %559 = vperm.xlu0 %1017, %v509_v19   ;;  %p1045_p4 = pnand %p1044_p3, %p1038_p0 }
  0x24   : > { %930 = vmatpush3.bf16.msra.mxu0 %v1024_v7  ;;  %574 = vperm.xlu1 %1018, %v512_v23  }
  0x25   : > { %931 = vmatprep.subr.bf16.mxu0 %v1025_v12  ;;  %569 = vperm.xlu0 %1017, %v511_v22  }
  0x28   : > { %932 = vmatpush3.bf16.msra.mxu0 %v1025_v12  ;;  %584 = vperm.xlu1 %1018, %v514_v26  }
  0x29   : > { %933 = vmatprep.subr.bf16.mxu0 %v1026_v15  ;;  %579 = vperm.xlu0 %1017, %v513_v25  }
  0x2c   : > { %934 = vmatpush3.bf16.msra.mxu0 %v1026_v15  ;;  %594 = vperm.xlu1 %1018, %v516_v29  }
  0x2d   : > { %589 = vperm.xlu0 %1017, %v515_v28  }
  0x2f   : > { %936 = vmatmul.mubr.bf16.vlgmr.msra.gmra.mrb[0].mxu0 %v1028_v18 }
  0x30   : > { %939 = vmatprep.mubr.bf16.mxu0 %v1029_v21  ;;  %707 = vperm.xlu1 %1018, %v693_v32  }
  0x31   : > { %702 = vperm.xlu0 %1017, %v692_v31  }
  0x34   : > { %717 = vperm.xlu1 %1018, %v695_v35   ;;  %v622_v35 = vld [vmem:[%s1290_s29 + $0x8] sm:$0xff] }
  0x35   : > { %712 = vperm.xlu0 %1017, %v694_v34  }
  0x37   : > { %940 = vmatmul.mubr.bf16.gmra.mrb[4].mxu0 %v1030_v24 }
  0x38   : > { %943 = vmatprep.mubr.bf16.mxu0 %v1031_v27  ;;  %727 = vperm.xlu1 %1018, %v697_v38   ;;  %v626_v38 = vunpack.c.h.s8.bf16 %v622_v35 }
  0x39   : > { %722 = vperm.xlu0 %1017, %v696_v37   ;;  %v625_v37 = vunpack.c.l.s8.bf16 %v622_v35 }
  0x3c   : > { %737 = vperm.xlu1 %1018, %v699_v40  }
  0x3d   : > { %732 = vperm.xlu0 %1017, %v698_v39  }
  0x3f   : > { %944 = vmatmul.mubr.bf16.gmra.mrb[8].mxu0 %v1032_v30 }
  0x40   : > { %947 = vmatprep.mubr.bf16.mxu0 %v1033_v33 }
  0x47   : > { %948 = vmatmul.mubr.bf16.gmra.mrb[12].mxu0 %v1034_v36  ;;  %v624_v36 = vunpack.c.h.s8.bf16 %v1293_v41 }
  0x8f   : > { %v530_v44 = vpop.permute.xlu1 %529 }
  0x90   : > { %v520_v43 = vpop.permute.xlu0 %519 }
  0x93   : > { %v535_v46 = vpop.permute.xlu1 %534 }
  0x94   : > { %v525_v45 = vpop.permute.xlu0 %524 }
  0x97   : > { %v545_v48 = vpop.permute.xlu1 %544 }
  0x98   : > { %v540_v47 = vpop.permute.xlu0 %539 }
  0x9b   : > { %v555_v52 = vpop.permute.xlu1 %554 }
  0x9c   : > { %v550_v50 = vpop.permute.xlu0 %549 }
  0x9f   : > { %v565_v62 = vpop.permute.xlu1 %564 }
  0xa0   : > { %v560_v61 = vpop.permute.xlu0 %559 }
  0xa3   : > { %v575_v9 = vpop.permute.xlu1 %574 }
  0xa4   : > { %v570_v7 = vpop.permute.xlu0 %569 }
  0xa7   : > { %v585_v18 = vpop.permute.xlu1 %584 }
  0xa8   : > { %v580_v14 = vpop.permute.xlu0 %579 }
  0xab   : > { %v595_v26 = vpop.permute.xlu1 %594 }
  0xac   : > { %v590_v24 = vpop.permute.xlu0 %589 }
  0xaf   : > { %v708_v40 = vpop.permute.xlu1 %707 }
  0xb0   : > { %v703_v39 = vpop.permute.xlu0 %702 }
  0xb4   : > { %v713_v42 = vpop.permute.xlu0 %712 }
 0x102   : > { %v937_v49 = vpop.f32.mrb[0].mxu0 }
 0x103   : > { %v438_v51 = vpop.f32.mrb[1].mxu0  ;;  %v599_v54 = vmul.f32 %v937_v49, %v530_v44 }
 0x104   : > { %v938_v53 = vpop.f32.mrb[2].mxu0  ;;  %v597_v57 = vmul.f32 %v520_v43, %v438_v51  ;;  %v718_v43 = vpop.permute.xlu1 %717 }
 0x105   : > { %v600_v55 = vmul.f32 %v938_v53, %v535_v46  ;;  %v441_v56 = vpop.f32.mrb[3].mxu0 }
 0x106   : > { %v598_v58 = vmul.f32 %v525_v45, %v441_v56  ;;  %v884_v45 = vld [vmem:[%s1360_s5] ss:$0 sm:$0xff] }
 0x107   : > { %v614_v59 = vpack.c.bf16 %v600_v55, %v599_v54 }
 0x108   : > { %v613_v60 = vpack.c.bf16 %v598_v58, %v597_v57  ;;  %v728_v53 = vpop.permute.xlu1 %727 }
 0x10a   : > { %v941_v63 = vpop.f32.mrb[4].mxu0  ;;  %951 = vmatprep.subr.bf16.mxu1 %v613_v60 }
 0x10b   : > { %v454_v0 = vpop.f32.mrb[5].mxu0  ;;  %952 = vmatpush3.bf16.msra.mxu1 %v613_v60  ;;  %v603_v2 = vmul.f32 %v941_v63, %v550_v50 }
 0x10c   : > { %v942_v1 = vpop.f32.mrb[6].mxu0  ;;  %953 = vmatprep.subr.bf16.mxu1 %v614_v59  ;;  %v601_v5 = vmul.f32 %v540_v47, %v454_v0  ;;  %v723_v47 = vpop.permute.xlu0 %722 }
 0x10d   : > { %v604_v3 = vmul.f32 %v942_v1, %v555_v52  ;;  %v457_v4 = vpop.f32.mrb[7].mxu0 }
 0x10e   : > { %v602_v6 = vmul.f32 %v545_v48, %v457_v4 }
 0x10f   : > { %v616_v8 = vpack.c.bf16 %v604_v3, %v603_v2  ;;  %954 = vmatpush3.bf16.msra.mxu1 %v614_v59 }
 0x110   : > { %v615_v10 = vpack.c.bf16 %v602_v6, %v601_v5  ;;  %v733_v58 = vpop.permute.xlu0 %732 }
 0x112   : > { %v945_v11 = vpop.f32.mrb[8].mxu0  ;;  %955 = vmatprep.subr.bf16.mxu1 %v615_v10 }
 0x113   : > { %v470_v12 = vpop.f32.mrb[9].mxu0  ;;  %956 = vmatpush3.bf16.msra.mxu1 %v615_v10  ;;  %v607_v15 = vmul.f32 %v945_v11, %v570_v7 }
 0x114   : > { %v946_v13 = vpop.f32.mrb[10].mxu0  ;;  %957 = vmatprep.subr.bf16.mxu1 %v616_v8  ;;  %v605_v19 = vmul.f32 %v560_v61, %v470_v12 }
 0x115   : > { %v608_v16 = vmul.f32 %v946_v13, %v575_v9  ;;  %v473_v17 = vpop.f32.mrb[11].mxu0 }
 0x116   : > { %v606_v20 = vmul.f32 %v565_v62, %v473_v17  ;;  %v738_v62 = vpop.permute.xlu1 %737 }
 0x117   : > { %v618_v21 = vpack.c.bf16 %v608_v16, %v607_v15  ;;  %958 = vmatpush3.bf16.msra.mxu1 %v616_v8 }
 0x118   : > { %v617_v22 = vpack.c.bf16 %v606_v20, %v605_v19 }
 0x11a   : > { %v949_v23 = vpop.f32.mrb[12].mxu0  ;;  %959 = vmatprep.subr.bf16.mxu1 %v617_v22 }
 0x11b   : > { %v486_v25 = vpop.f32.mrb[13].mxu0  ;;  %960 = vmatpush3.bf16.msra.mxu1 %v617_v22  ;;  %v611_v28 = vmul.f32 %v949_v23, %v590_v24 }
 0x11c   : > { %v950_v27 = vpop.f32.mrb[14].mxu0  ;;  %961 = vmatprep.subr.bf16.mxu1 %v618_v21  ;;  %v609_v31 = vmul.f32 %v580_v14, %v486_v25 }
 0x11d   : > { %v612_v29 = vmul.f32 %v950_v27, %v595_v26  ;;  %v489_v30 = vpop.f32.mrb[15].mxu0 }
 0x11e   : > { %v610_v32 = vmul.f32 %v585_v18, %v489_v30 }
 0x11f   : > { %v620_v33 = vpack.c.bf16 %v612_v29, %v611_v28  ;;  %962 = vmatpush3.bf16.msra.mxu1 %v618_v21 }
 0x120   : > { %v619_v34 = vpack.c.bf16 %v610_v32, %v609_v31 }
 0x122   : > { %963 = vmatprep.subr.bf16.mxu1 %v619_v34 }
 0x123   : > { %964 = vmatpush3.bf16.msra.mxu1 %v619_v34 }
 0x124   : > { %965 = vmatprep.subr.bf16.mxu1 %v620_v33 }
 0x127   : > { %966 = vmatpush3.bf16.msra.mxu1 %v620_v33 }
 0x12a   : > { %968 = vmatmul.mubr.bf16.vlgmr.msra.gmra.mrb[0].mxu1 %v624_v36 }
 0x12b   : > { %971 = vmatprep.mubr.bf16.mxu1 %v625_v37 }
 0x132   : > { %972 = vmatmul.mubr.bf16.gmra.mrb[4].mxu1 %v626_v38 }
 0x1fd   : > { %v969_v44 = vpop.f32.mrb[0].mxu1 }
 0x1fe   : > { %v742_v46 = vmul.f32 %v969_v44, %v713_v42  ;;  %v661_v41 = vpop.f32.mrb[1].mxu1 }
 0x1ff   : > { %v740_v48 = vmul.f32 %v703_v39, %v661_v41  ;;  %v970_v49 = vpop.f32.mrb[2].mxu1 }
 0x200   : > { %v757_v50 = vadd.f32 %v884_v45, %v742_v46  ;;  %v743_v51 = vmul.f32 %v970_v49, %v718_v43  ;;  %v664_v52 = vpop.f32.mrb[3].mxu1 }
 0x201   : > { %v755_v54 = vadd.f32 %v884_v45, %v740_v48  ;;  %v741_v55 = vmul.f32 %v708_v40, %v664_v52 }
 0x202   : > { %765 = vst [vmem:[%s261_s14 + $0x10] sm:$0xff] %v757_v50  ;;  %v758_v56 = vadd.f32 %v884_v45, %v743_v51 }
 0x203   : > { %763 = vst [vmem:[%s261_s14] sm:$0xff] %v755_v54  ;;  %v756_v57 = vadd.f32 %v884_v45, %v741_v55 }
 0x204   : > { %766 = vst [vmem:[%s261_s14 + $0x18] sm:$0xff] %v758_v56 }
 0x205   : > { %764 = vst [vmem:[%s261_s14 + $0x8] sm:$0xff] %v756_v57  ;;  %v973_v59 = vpop.f32.mrb[4].mxu1 }
 0x206   : > { %v746_v60 = vmul.f32 %v973_v59, %v733_v58  ;;  %v677_v61 = vpop.f32.mrb[5].mxu1 }
 0x207   : > { %v744_v63 = vmul.f32 %v723_v47, %v677_v61  ;;  %v974_v0 = vpop.f32.mrb[6].mxu1 }
 0x208   : > { %v761_v1 = vadd.f32 %v884_v45, %v746_v60  ;;  %v747_v2 = vmul.f32 %v974_v0, %v738_v62  ;;  %v680_v3 = vpop.f32.mrb[7].mxu1 }
 0x209   : > { %v759_v4 = vadd.f32 %v884_v45, %v744_v63  ;;  %v745_v5 = vmul.f32 %v728_v53, %v680_v3 }
 0x20a   : > { %769 = vst [vmem:[%s261_s14 + $0x30] sm:$0xff] %v761_v1  ;;  %v762_v6 = vadd.f32 %v884_v45, %v747_v2 }
 0x20b   : > { %767 = vst [vmem:[%s261_s14 + $0x20] sm:$0xff] %v759_v4  ;;  %v760_v7 = vadd.f32 %v884_v45, %v745_v5 }
 0x20c   : > { %770 = vst [vmem:[%s261_s14 + $0x38] sm:$0xff] %v762_v6 }
 0x20d   : > { %768 = vst [vmem:[%s261_s14 + $0x28] sm:$0xff] %v760_v7 }
 0x20e   : > { %1048 = shalt.err (!%p1045_p4)
}
 0x20f   : > { %s1049_s29 = scalar_lea.hbm %s1308_s18, 1024  ;;  %s1053_s11 = scalar_lea.hbm %s1361_s6, 2048 }
 0x210   : > { %p1050_p7 = scmp.ne.s32.totalorder %s1308_s18, %s1049_s29  ;;  %p1054_p10 = scmp.lt.u32.totalorder %s1308_s18, %s1361_s6 }
 0x211   : > { %p1055_p11 = scmp.lt.u32.totalorder %s1053_s11, %s1049_s29  ;;  %p1057_p13 = scmp.lt.u32.totalorder %s1049_s29, %s1308_s18 }
 0x212   : > { %p1051_p8 = pnand %p1050_p7, %p1176_p5 }
 0x213   : > { %p1056_p12 = por %p1055_p11, %p1054_p10 }
 0x214   : > { %p1052_p9 = pneg %p1051_p8 }
 0x215   : > { %p1058_p0 = por %p1057_p13, %p1056_p12 }
 0x217   : > { %p1059_p1 = pnand %p1058_p0, %p1052_p9 }
 0x219   : > { %1062 = shalt.err (!%p1059_p1)
}
 0x21a   : > { %s1101_s13 = smov 128   ;;  %s1102_s16 = smov 8  }
 0x21b   : > { %975 = dma.vmem_to_hbm [thread:$0]  (%p1176_p5), %s1310_s15, 1024, %s1308_s18, %s1314_s25, %s1101_s13, %s1101_s13, %s1102_s16  }
 0x21c PF: > { %p981_p2 = scmp.ge.s32.totalorder %s1097_s24, 2  ;;  %s800_s17 = sand.u32 1, %s1085_s21  }
 0x21d   : > { %s801_s19 = scalar_lea.sflag [#allocation3], %s800_s17 }
 0x21e   : > { %p978_p3 = pnand %p981_p2, %p1180_p6 }
 0x220   : > { %1080 = dma.done.wait (!%p978_p3), %s801_s19, 1024  }
 0x221   : > { %1082 = vsyncadd (!%p978_p3), %s801_s19, 4294966272  ;;  %p16_p4 = scmp.ge.s32.totalorder %s1163_s27, 4   ;;  %s1364_s21 = smov %s1089_s22 }
 0x222   : > { %s1365_s22 = smov %s1093_s23  ;;  %s1366_s23 = smov %s1174_s30 }
 0x223   : > { %s1367_s24 = smov %s1163_s27  ;;  %18 = sbr.rel (!%p16_p4) target bundleno = 3 (0x3), region = 82 }
 0x22a   :  { %806 = vsyncpa [#allocation3], 1 }
 0x22b   :  { %808 = vsyncpa [#allocation3 + $0x1], 1 }

// kernel: gcn_forward_padded.4
= control target key start
LH: loop header
LB: loop body
LE: loop exit
PB: predicated region body
PF: predicated region fallthrough
CT: control target
= control target key end

     0   :  { %s1105_s21 = smov 0   ;;  %s1240_s0 = inlined_call_operand.vmem [shape: s8[128,128], index: 0, kind: input, shape index: {}]   ;;  %s1241_s1 = inlined_call_operand.vmem [shape: bf16[128,128], index: 1, kind: input, shape index: {}]   ;;  %s1242_s2 = inlined_call_operand.vmem [shape: bf16[128,128], index: 2, kind: input, shape index: {}]   ;;  %s1243_s3 = inlined_call_operand.vmem [shape: f32[128,1], index: 3, kind: input, shape index: {}, may-alias: {3,4}]   ;;  %s1244_s4 = inlined_call_operand.vmem [shape: f32[128,1], index: 4, kind: input, shape index: {}, may-alias: {3,4}]   ;;  %s1245_s5 = inlined_call_operand.vmem [shape: f32[1,128], index: 5, kind: input, shape index: {}]   ;;  %s1246_s6 = inlined_call_operand.vmem [shape: bf16[128,128], index: 6, kind: output, shape index: {}]  }
   0x1 LB: > { %s881_s22 = sadd.s32 4294967295, %s1067_s21   ;;  %p885_p0 = scmp.ge.s32.totalorder %s1067_s21, 1  ;;  %s1067_s21 = sphi %s1105_s21, %s16_s21  }
   0x2   : > { %p224_p1 = scmp.lt.s32.totalorder %s1067_s21, 3 }
   0x4   : > { %p225_p2 = pnand %p885_p0, %p224_p1 }
   0x5   : > { %v1045_v0 = vld [vmem:[%s1242_s2] sm:$0xff] (!%p225_p2)   ;;  %v1046_v1 = vld [vmem:[%s1242_s2 + $0x8] sm:$0xff] (!%p225_p2)   ;;  %v1069_v2 = vmov (!%p225_p2), 0   ;;  %v1047_v3 = vld [vmem:[%s1242_s2 + $0x10] sm:$0xff] (!%p225_p2)   ;;  %s888_s11 = sshll.u32 (!%p225_p2), %s881_s22, 3  ;;  %s886_s27 = sshll.u32 (!%p225_p2), %s881_s22, 1 }
   0x6   : > { %228 = sbr.rel (%p225_p2) target bundleno = 522 (0x20a), region = 44  ;;  %1043 = vset.pattern.permute.xlu0 (!%p225_p2), %v1069_v2  ;;  %1044 = vset.pattern.permute.xlu1 (!%p225_p2), %v1069_v2  ;;  %v1048_v4 = vld [vmem:[%s1242_s2 + $0x18] sm:$0xff] (!%p225_p2)   ;;  %v1053_v5 = vld [vmem:[%s1241_s1] sm:$0xff] (!%p225_p2)   ;;  %v1050_v7 = vld [vmem:[%s1242_s2 + $0x28] sm:$0xff] (!%p225_p2)   ;;  %p266_p3 = scmp.lt.s32.totalorder (!%p225_p2), %s888_s11, 15 }
   0x7   : > { %978 = vmatprep.subr.bf16.mxu0 (!%p225_p2), %v1045_v0  ;;  %994 = vmatprep.mubr.bf16.mxu0 (!%p225_p2), %v1053_v5  ;;  %v1049_v6 = vld [vmem:[%s1242_s2 + $0x20] sm:$0xff] (!%p225_p2)   ;;  %v505_v9 = vld [vmem:[%s1243_s3 + $0x10] sm:$0xff] (!%p225_p2)  ;;  %v504_v10 = vld [vmem:[%s1243_s3 + $0x8] sm:$0xff] (!%p225_p2)  ;;  %p260_p4 = scmp.lt.s32.totalorder (!%p225_p2), %s886_s27, 3 }
   0x8   : > { %979 = vmatpush3.bf16.msra.mxu0 (!%p225_p2), %v1045_v0  ;;  %v503_v8 = vld [vmem:[%s1243_s3] sm:$0xff] (!%p225_p2)  ;;  %531 = vperm.xlu1 (!%p225_p2), %1044, %v505_v9   ;;  %v506_v11 = vld [vmem:[%s1243_s3 + $0x18] sm:$0xff] (!%p225_p2)  ;;  %v1051_v12 = vld [vmem:[%s1242_s2 + $0x30] sm:$0xff] (!%p225_p2)  }
   0x9   : > { %980 = vmatprep.subr.bf16.mxu0 (!%p225_p2), %v1046_v1  ;;  %521 = vperm.xlu0 (!%p225_p2), %1043, %v503_v8   ;;  %v507_v13 = vld [vmem:[%s1243_s3 + $0x20] sm:$0xff] (!%p225_p2)  ;;  %v508_v14 = vld [vmem:[%s1243_s3 + $0x28] sm:$0xff] (!%p225_p2)  ;;  %v1052_v15 = vld [vmem:[%s1242_s2 + $0x38] sm:$0xff] (!%p225_p2)  }
   0xa   : > { %v509_v16 = vld [vmem:[%s1243_s3 + $0x30] sm:$0xff] (!%p225_p2)  ;;  %v510_v17 = vld [vmem:[%s1243_s3 + $0x38] sm:$0xff] (!%p225_p2)  ;;  %v1054_v18 = vld [vmem:[%s1241_s1 + $0x8] sm:$0xff] (!%p225_p2)  }
   0xb   : > { %v511_v19 = vld [vmem:[%s1243_s3 + $0x40] sm:$0xff] (!%p225_p2)  ;;  %v512_v20 = vld [vmem:[%s1243_s3 + $0x48] sm:$0xff] (!%p225_p2)  ;;  %v1055_v21 = vld [vmem:[%s1241_s1 + $0x10] sm:$0xff] (!%p225_p2)  }
   0xc   : > { %981 = vmatpush3.bf16.msra.mxu0 (!%p225_p2), %v1046_v1  ;;  %536 = vperm.xlu1 (!%p225_p2), %1044, %v506_v11   ;;  %v513_v22 = vld [vmem:[%s1243_s3 + $0x50] sm:$0xff] (!%p225_p2)  ;;  %v514_v23 = vld [vmem:[%s1243_s3 + $0x58] sm:$0xff] (!%p225_p2)  ;;  %v515_v25 = vld [vmem:[%s1243_s3 + $0x60] sm:$0xff] (!%p225_p2) }
   0xd   : > { %982 = vmatprep.subr.bf16.mxu0 %v1047_v3  ;;  %526 = vperm.xlu0 %1043, %v504_v10   ;;  %s1248_s11 = smov (!%p266_p3, %s888_s11), 15  ;;  %v1056_v24 = vld [vmem:[%s1241_s1 + $0x18] sm:$0xff]   ;;  %v516_v26 = vld [vmem:[%s1243_s3 + $0x68] sm:$0xff]  ;;  %v1057_v27 = vld [vmem:[%s1241_s1 + $0x20] sm:$0xff]   ;;  %s1250_s27 = smov (!%p260_p4, %s886_s27), 3 }
   0xe   : > { %s889_s10 = sshll.u32 %s1248_s11, 3  ;;  %v517_v28 = vld [vmem:[%s1243_s3 + $0x70] sm:$0xff]  ;;  %v518_v29 = vld [vmem:[%s1243_s3 + $0x78] sm:$0xff]  ;;  %v1058_v30 = vld [vmem:[%s1241_s1 + $0x28] sm:$0xff]   ;;  %s887_s28 = sshll.u32 %s1250_s27, 3 }
   0xf   : > { %s269_s18 = scalar_lea.vmem %s1244_s4, %s889_s10  ;;  %v1059_v33 = vld [vmem:[%s1241_s1 + $0x30] sm:$0xff]   ;;  %v1060_v36 = vld [vmem:[%s1241_s1 + $0x38] sm:$0xff]   ;;  %s1222_s7 = scalar_lea.vmem %s1240_s0, %s887_s28 }
  0x10   : > { %983 = vmatpush3.bf16.msra.mxu0 %v1047_v3  ;;  %546 = vperm.xlu1 %1044, %v508_v14   ;;  %v694_v31 = vld [vmem:[%s269_s18] sm:$0xff]  ;;  %v695_v32 = vld [vmem:[%s269_s18 + $0x8] sm:$0xff]  ;;  %v696_v34 = vld [vmem:[%s269_s18 + $0x10] sm:$0xff]  ;;  %s891_s9 = sshll.u32 %s1248_s11, 2 }
  0x11   : > { %984 = vmatprep.subr.bf16.mxu0 %v1048_v4  ;;  %541 = vperm.xlu0 %1043, %v507_v13   ;;  %v697_v35 = vld [vmem:[%s269_s18 + $0x18] sm:$0xff]  ;;  %v698_v37 = vld [vmem:[%s269_s18 + $0x20] sm:$0xff]  ;;  %v699_v38 = vld [vmem:[%s269_s18 + $0x28] sm:$0xff]  ;;  %s275_s13 = scalar_lea.vmem %s1246_s6, %s891_s9 }
  0x12   : > { %v700_v39 = vld [vmem:[%s269_s18 + $0x30] sm:$0xff]  ;;  %v701_v40 = vld [vmem:[%s269_s18 + $0x38] sm:$0xff]  ;;  %v1225_v41 = vld [vmem:[%s1222_s7] sm:$0xff] }
  0x13   : > { %v625_v42 = vunpack.c.l.s8.bf16 %v1225_v41 }
  0x14   : > { %985 = vmatpush3.bf16.msra.mxu0 %v1048_v4  ;;  %556 = vperm.xlu1 %1044, %v510_v17  }
  0x15   : > { %986 = vmatprep.subr.bf16.mxu0 %v1049_v6  ;;  %551 = vperm.xlu0 %1043, %v509_v16  }
  0x16   : > { %1026 = vmatprep.mubr.bf16.mxu1 %v625_v42 }
  0x18   : > { %987 = vmatpush3.bf16.msra.mxu0 %v1049_v6  ;;  %566 = vperm.xlu1 %1044, %v512_v20  }
  0x19   : > { %988 = vmatprep.subr.bf16.mxu0 %v1050_v7  ;;  %561 = vperm.xlu0 %1043, %v511_v19  }
  0x1c   : > { %989 = vmatpush3.bf16.msra.mxu0 %v1050_v7  ;;  %576 = vperm.xlu1 %1044, %v514_v23  }
  0x1d   : > { %990 = vmatprep.subr.bf16.mxu0 %v1051_v12  ;;  %571 = vperm.xlu0 %1043, %v513_v22  }
  0x20   : > { %991 = vmatpush3.bf16.msra.mxu0 %v1051_v12  ;;  %586 = vperm.xlu1 %1044, %v516_v26  }
  0x21   : > { %992 = vmatprep.subr.bf16.mxu0 %v1052_v15  ;;  %581 = vperm.xlu0 %1043, %v515_v25  }
  0x24   : > { %993 = vmatpush3.bf16.msra.mxu0 %v1052_v15  ;;  %596 = vperm.xlu1 %1044, %v518_v29  }
  0x25   : > { %591 = vperm.xlu0 %1043, %v517_v28  }
  0x27   : > { %995 = vmatmul.mubr.bf16.vlgmr.msra.gmra.mrb[0].mxu0 %v1054_v18 }
  0x28   : > { %998 = vmatprep.mubr.bf16.mxu0 %v1055_v21  ;;  %709 = vperm.xlu1 %1044, %v695_v32  }
  0x29   : > { %704 = vperm.xlu0 %1043, %v694_v31  }
  0x2c   : > { %719 = vperm.xlu1 %1044, %v697_v35   ;;  %v624_v35 = vld [vmem:[%s1222_s7 + $0x8] sm:$0xff] }
  0x2d   : > { %714 = vperm.xlu0 %1043, %v696_v34  }
  0x2f   : > { %999 = vmatmul.mubr.bf16.gmra.mrb[4].mxu0 %v1056_v24 }
  0x30   : > { %1002 = vmatprep.mubr.bf16.mxu0 %v1057_v27  ;;  %729 = vperm.xlu1 %1044, %v699_v38   ;;  %v628_v38 = vunpack.c.h.s8.bf16 %v624_v35 }
  0x31   : > { %724 = vperm.xlu0 %1043, %v698_v37   ;;  %v627_v37 = vunpack.c.l.s8.bf16 %v624_v35 }
  0x34   : > { %739 = vperm.xlu1 %1044, %v701_v40  }
  0x35   : > { %734 = vperm.xlu0 %1043, %v700_v39  }
  0x37   : > { %1003 = vmatmul.mubr.bf16.gmra.mrb[8].mxu0 %v1058_v30 }
  0x38   : > { %1006 = vmatprep.mubr.bf16.mxu0 %v1059_v33 }
  0x3f   : > { %1007 = vmatmul.mubr.bf16.gmra.mrb[12].mxu0 %v1060_v36  ;;  %v626_v36 = vunpack.c.h.s8.bf16 %v1225_v41 }
  0x87   : > { %v532_v44 = vpop.permute.xlu1 %531 }
  0x88   : > { %v522_v43 = vpop.permute.xlu0 %521 }
  0x8b   : > { %v537_v46 = vpop.permute.xlu1 %536 }
  0x8c   : > { %v527_v45 = vpop.permute.xlu0 %526 }
  0x8f   : > { %v547_v48 = vpop.permute.xlu1 %546 }
  0x90   : > { %v542_v47 = vpop.permute.xlu0 %541 }
  0x93   : > { %v557_v52 = vpop.permute.xlu1 %556 }
  0x94   : > { %v552_v50 = vpop.permute.xlu0 %551 }
  0x97   : > { %v567_v62 = vpop.permute.xlu1 %566 }
  0x98   : > { %v562_v61 = vpop.permute.xlu0 %561 }
  0x9b   : > { %v577_v9 = vpop.permute.xlu1 %576 }
  0x9c   : > { %v572_v7 = vpop.permute.xlu0 %571 }
  0x9f   : > { %v587_v18 = vpop.permute.xlu1 %586 }
  0xa0   : > { %v582_v14 = vpop.permute.xlu0 %581 }
  0xa3   : > { %v597_v26 = vpop.permute.xlu1 %596 }
  0xa4   : > { %v592_v24 = vpop.permute.xlu0 %591 }
  0xa7   : > { %v710_v40 = vpop.permute.xlu1 %709 }
  0xa8   : > { %v705_v39 = vpop.permute.xlu0 %704 }
  0xac   : > { %v715_v42 = vpop.permute.xlu0 %714 }
  0xfa   : > { %v996_v49 = vpop.f32.mrb[0].mxu0 }
  0xfb   : > { %v440_v51 = vpop.f32.mrb[1].mxu0  ;;  %v601_v54 = vmul.f32 %v996_v49, %v532_v44 }
  0xfc   : > { %v997_v53 = vpop.f32.mrb[2].mxu0  ;;  %v599_v57 = vmul.f32 %v522_v43, %v440_v51  ;;  %v720_v43 = vpop.permute.xlu1 %719 }
  0xfd   : > { %v602_v55 = vmul.f32 %v997_v53, %v537_v46  ;;  %v443_v56 = vpop.f32.mrb[3].mxu0 }
  0xfe   : > { %v600_v58 = vmul.f32 %v527_v45, %v443_v56  ;;  %v908_v45 = vld [vmem:[%s1245_s5] ss:$0 sm:$0xff] }
  0xff   : > { %v616_v59 = vpack.c.bf16 %v602_v55, %v601_v54 }
 0x100   : > { %v615_v60 = vpack.c.bf16 %v600_v58, %v599_v57  ;;  %v730_v53 = vpop.permute.xlu1 %729 }
 0x102   : > { %v1000_v63 = vpop.f32.mrb[4].mxu0  ;;  %1010 = vmatprep.subr.bf16.mxu1 %v615_v60 }
 0x103   : > { %v456_v0 = vpop.f32.mrb[5].mxu0  ;;  %1011 = vmatpush3.bf16.msra.mxu1 %v615_v60  ;;  %v605_v2 = vmul.f32 %v1000_v63, %v552_v50 }
 0x104   : > { %v1001_v1 = vpop.f32.mrb[6].mxu0  ;;  %1012 = vmatprep.subr.bf16.mxu1 %v616_v59  ;;  %v603_v5 = vmul.f32 %v542_v47, %v456_v0 }
 0x105   : > { %v606_v3 = vmul.f32 %v1001_v1, %v557_v52  ;;  %v459_v4 = vpop.f32.mrb[7].mxu0 }
 0x106   : > { %v604_v6 = vmul.f32 %v547_v48, %v459_v4  ;;  %v725_v48 = vpop.permute.xlu0 %724 }
 0x107   : > { %v618_v8 = vpack.c.bf16 %v606_v3, %v605_v2  ;;  %1013 = vmatpush3.bf16.msra.mxu1 %v616_v59  ;;  %v740_v3 = vpop.permute.xlu1 %739 }
 0x108   : > { %v617_v10 = vpack.c.bf16 %v604_v6, %v603_v5 }
 0x10a   : > { %v1004_v11 = vpop.f32.mrb[8].mxu0  ;;  %1014 = vmatprep.subr.bf16.mxu1 %v617_v10  ;;  %v735_v60 = vpop.permute.xlu0 %734 }
 0x10b   : > { %v472_v12 = vpop.f32.mrb[9].mxu0  ;;  %1015 = vmatpush3.bf16.msra.mxu1 %v617_v10  ;;  %v609_v15 = vmul.f32 %v1004_v11, %v572_v7 }
 0x10c   : > { %v1005_v13 = vpop.f32.mrb[10].mxu0  ;;  %1016 = vmatprep.subr.bf16.mxu1 %v618_v8  ;;  %v607_v19 = vmul.f32 %v562_v61, %v472_v12 }
 0x10d   : > { %v610_v16 = vmul.f32 %v1005_v13, %v577_v9  ;;  %v475_v17 = vpop.f32.mrb[11].mxu0 }
 0x10e   : > { %v608_v20 = vmul.f32 %v567_v62, %v475_v17 }
 0x10f   : > { %v620_v21 = vpack.c.bf16 %v610_v16, %v609_v15  ;;  %1017 = vmatpush3.bf16.msra.mxu1 %v618_v8 }
 0x110   : > { %v619_v22 = vpack.c.bf16 %v608_v20, %v607_v19 }
 0x112   : > { %v1008_v23 = vpop.f32.mrb[12].mxu0  ;;  %1018 = vmatprep.subr.bf16.mxu1 %v619_v22 }
 0x113   : > { %v488_v25 = vpop.f32.mrb[13].mxu0  ;;  %1019 = vmatpush3.bf16.msra.mxu1 %v619_v22  ;;  %v613_v28 = vmul.f32 %v1008_v23, %v592_v24 }
 0x114   : > { %v1009_v27 = vpop.f32.mrb[14].mxu0  ;;  %1020 = vmatprep.subr.bf16.mxu1 %v620_v21  ;;  %v611_v31 = vmul.f32 %v582_v14, %v488_v25 }
 0x115   : > { %v614_v29 = vmul.f32 %v1009_v27, %v597_v26  ;;  %v491_v30 = vpop.f32.mrb[15].mxu0 }
 0x116   : > { %v612_v32 = vmul.f32 %v587_v18, %v491_v30 }
 0x117   : > { %v622_v33 = vpack.c.bf16 %v614_v29, %v613_v28  ;;  %1021 = vmatpush3.bf16.msra.mxu1 %v620_v21 }
 0x118   : > { %v621_v34 = vpack.c.bf16 %v612_v32, %v611_v31 }
 0x11a   : > { %1022 = vmatprep.subr.bf16.mxu1 %v621_v34 }
 0x11b   : > { %1023 = vmatpush3.bf16.msra.mxu1 %v621_v34 }
 0x11c   : > { %1024 = vmatprep.subr.bf16.mxu1 %v622_v33 }
 0x11f   : > { %1025 = vmatpush3.bf16.msra.mxu1 %v622_v33 }
 0x122   : > { %1027 = vmatmul.mubr.bf16.vlgmr.msra.gmra.mrb[0].mxu1 %v626_v36 }
 0x123   : > { %1030 = vmatprep.mubr.bf16.mxu1 %v627_v37 }
 0x12a   : > { %1031 = vmatmul.mubr.bf16.gmra.mrb[4].mxu1 %v628_v38 }
 0x1f5   : > { %v1028_v44 = vpop.f32.mrb[0].mxu1 }
 0x1f6   : > { %v744_v46 = vmul.f32 %v1028_v44, %v715_v42  ;;  %v663_v47 = vpop.f32.mrb[1].mxu1 }
 0x1f7   : > { %v742_v41 = vmul.f32 %v705_v39, %v663_v47  ;;  %v1029_v49 = vpop.f32.mrb[2].mxu1 }
 0x1f8   : > { %v759_v50 = vadd.f32 %v908_v45, %v744_v46  ;;  %v745_v51 = vmul.f32 %v1029_v49, %v720_v43  ;;  %v666_v52 = vpop.f32.mrb[3].mxu1 }
 0x1f9   : > { %v757_v54 = vadd.f32 %v908_v45, %v742_v41  ;;  %v743_v55 = vmul.f32 %v710_v40, %v666_v52 }
 0x1fa   : > { %v760_v56 = vadd.f32 %v908_v45, %v745_v51  ;;  %v767_v58 = vmax.f32 %v759_v50, 0.0 }
 0x1fb   : > { %v758_v57 = vadd.f32 %v908_v45, %v743_v55  ;;  %v765_v61 = vmax.f32 %v757_v54, 0.0 }
 0x1fc   : > { %v768_v59 = vmax.f32 %v760_v56, 0.0 }
 0x1fd   : > { %v766_v62 = vmax.f32 %v758_v57, 0.0  ;;  %v1032_v63 = vpop.f32.mrb[4].mxu1 }
 0x1fe   : > { %v935_v0 = vpack.c.bf16 %v768_v59, %v767_v58  ;;  %v748_v1 = vmul.f32 %v1032_v63, %v735_v60  ;;  %v679_v2 = vpop.f32.mrb[5].mxu1 }
 0x1ff   : > { %v930_v4 = vpack.c.bf16 %v766_v62, %v765_v61  ;;  %v746_v5 = vmul.f32 %v725_v48, %v679_v2  ;;  %v1033_v6 = vpop.f32.mrb[6].mxu1 }
 0x200   : > { %947 = vst [vmem:[%s275_s13 + $0x8] sm:$0xff] %v935_v0   ;;  %v763_v7 = vadd.f32 %v908_v45, %v748_v1  ;;  %v749_v8 = vmul.f32 %v1033_v6, %v740_v3  ;;  %v682_v9 = vpop.f32.mrb[7].mxu1 }
 0x201   : > { %931 = vst [vmem:[%s275_s13] sm:$0xff] %v930_v4   ;;  %v761_v10 = vadd.f32 %v908_v45, %v746_v5  ;;  %v747_v11 = vmul.f32 %v730_v53, %v682_v9 }
 0x202   : > { %v764_v12 = vadd.f32 %v908_v45, %v749_v8  ;;  %v771_v14 = vmax.f32 %v763_v7, 0.0 }
 0x203   : > { %v762_v13 = vadd.f32 %v908_v45, %v747_v11  ;;  %v769_v16 = vmax.f32 %v761_v10, 0.0 }
 0x204   : > { %v772_v15 = vmax.f32 %v764_v12, 0.0 }
 0x205   : > { %v770_v17 = vmax.f32 %v762_v13, 0.0 }
 0x206   : > { %v945_v18 = vpack.c.bf16 %v772_v15, %v771_v14 }
 0x207   : > { %v940_v19 = vpack.c.bf16 %v770_v17, %v769_v16 }
 0x208   : > { %949 = vst [vmem:[%s275_s13 + $0x18] sm:$0xff] %v945_v18  }
 0x209   : > { %948 = vst [vmem:[%s275_s13 + $0x10] sm:$0xff] %v940_v19  }
 0x20a PF: > { %s16_s21 = sadd.s32 1, %s1067_s21  }
 0x20b   : > { %p13_p5 = scmp.ge.s32.totalorder %s16_s21, 4  }
 0x20d   :  { %15 = sbr.rel (!%p13_p5) target bundleno = 1 (0x1), region = 77 }

// kernel: gcn_forward_padded.3
= control target key start
LH: loop header
LB: loop body
LE: loop exit
PB: predicated region body
PF: predicated region fallthrough
CT: control target
= control target key end

     0   :  { %11 = vsyncpa [#allocation3], 0  ;;  %s1182_s21 = smov 0   ;;  %s1328_s0 = inlined_call_operand.vmem [shape: s8[128,128], index: 0, kind: input, shape index: {}]   ;;  %s1329_s1 = inlined_call_operand.vmem [shape: bf16[128,128], index: 1, kind: input, shape index: {}]   ;;  %s1330_s2 = inlined_call_operand.hbm [shape: bf16[128,128], index: 2, kind: input, shape index: {}]   ;;  %s1331_s3 = inlined_call_operand.vmem [shape: f32[128,1], index: 3, kind: input, shape index: {}, may-alias: {3,4}]   ;;  %s1332_s4 = inlined_call_operand.vmem [shape: f32[128,1], index: 4, kind: input, shape index: {}, may-alias: {3,4}]   ;;  %s1333_s5 = inlined_call_operand.vmem [shape: f32[1,128], index: 5, kind: input, shape index: {}]   ;;  %s1334_s6 = inlined_call_operand.vmem [shape: bf16[128,128], index: 6, kind: output, shape index: {}]  }
   0x1 LB: > { %s1188_s22 = sadd.s32 4294967295, %s1141_s21   ;;  %p910_p0 = scmp.ge.s32.totalorder %s1141_s21, 1  ;;  %s1141_s21 = sphi %s1182_s21, %s17_s21  }
   0x2   : > { %p184_p1 = scmp.lt.s32.totalorder %s1141_s21, 3  ;;  %s1143_s23 = smov [#allocation2]  }
   0x3   : > { %s199_s24 = sshll.u32 %s1143_s23, 4  ;;  %p1335_p3 = scmp.eq.s32.totalorder %s1188_s22, 0  ;;  %s200_s24 = int_to_ptr.vmem [resolvable:$true] %s199_s24 }
   0x4   : > { %p1192_p2 = pnand %p910_p0, %p184_p1  ;;  %s1103_s29 = scalar_lea.hbm %s1330_s2, 1024 }
   0x5   : > { %p1104_p6 = scmp.ne.s32.totalorder %s1330_s2, %s1103_s29  ;;  %p1110_p10 = scmp.lt.u32.totalorder %s1103_s29, %s1330_s2 }
   0x6   : > { %s1337_s25 = scalar_select %p1192_p2, 1, 0 }
   0x7   : > { %p1067_p4 = pneg %p1192_p2 }
   0x9   : > { %p1201_p5 = pnand %p1335_p3, %p1067_p4 }
   0xb   : > { %p1105_p7 = pneg %p1201_p5 }
   0xd   : > { %p1106_p8 = pnand %p1105_p7, %p1104_p6 }
   0xf   : > { %p1107_p9 = pneg %p1106_p8 }
  0x11   : > { %p1112_p11 = pnand %p1110_p10, %p1107_p9 }
  0x13   : > { %1115 = shalt.err (!%p1112_p11)
}
  0x14   : > { %s1116_s10 = scalar_lea.vmem %s200_s24, 1024  ;;  %p1124_p1 = scmp.lt.s32.totalorder %s200_s24, %s200_s24 }
  0x15   : > { %p1117_p12 = scmp.ne.s32.totalorder %s200_s24, %s1116_s10  ;;  %p1125_p4 = scmp.lt.s32.totalorder %s1116_s10, %s1116_s10 }
  0x17   : > { %p1119_p13 = pnand %p1117_p12, %p1105_p7  ;;  %p1126_p3 = por %p1125_p4, %p1124_p1 }
  0x19   : > { %p1120_p0 = pneg %p1119_p13 }
  0x1b   : > { %p1127_p2 = pnand %p1126_p3, %p1120_p0 }
  0x1d   : > { %1130 = shalt.err (!%p1127_p2)
}
  0x1e   : > { %s1144_s11 = smov 64   ;;  %s1145_s12 = smov 4  }
  0x1f   : > { %1070 = dma.hbm_to_vmem [thread:$0]  (!%p1201_p5), %s1330_s2, 1024, %s200_s24, [#allocation3], %s1144_s11, %s1144_s11, %s1145_s12  }
  0x20   : > { %p1339_p6 = scmp.ne.s32.totalorder %s1337_s25, 0 }
  0x21   : > { %p1340_p8 = scmp.eq.s32.totalorder (!%p1339_p6), %s1188_s22, 0 }
  0x22   : > { %239 = sbr.rel (%p1339_p6) target bundleno = 559 (0x22f), region = 44 }
  0x29   : > { %1136 = dma.done.wait (%p1340_p8), [#allocation3], 1024   ;;  %p1341_p7 = pmov %p1340_p8 }
  0x2a   : > { %v1146_v0 = vmov 0   ;;  %v1087_v1 = vld [vmem:[#allocation2] sm:$0xff]   ;;  %v1088_v2 = vld [vmem:[#allocation2 + $0x8] sm:$0xff]   ;;  %v1089_v3 = vld [vmem:[#allocation2 + $0x10] sm:$0xff]   ;;  %s917_s11 = sshll.u32 %s1188_s22, 3  ;;  %s915_s27 = sshll.u32 %s1188_s22, 1 }
  0x2b   : > { %1138 = vsyncadd (%p1341_p7), [#allocation3], 4294966272  ;;  %1085 = vset.pattern.permute.xlu0 %v1146_v0  ;;  %1086 = vset.pattern.permute.xlu1 %v1146_v0  ;;  %v1090_v4 = vld [vmem:[#allocation2 + $0x18] sm:$0xff]   ;;  %v1095_v5 = vld [vmem:[%s1329_s1] sm:$0xff]   ;;  %p281_p2 = scmp.lt.s32.totalorder %s917_s11, 15  ;;  %p275_p3 = scmp.lt.s32.totalorder %s915_s27, 3 }
  0x2c   : > { %1007 = vmatprep.subr.bf16.mxu0 %v1087_v1  ;;  %1023 = vmatprep.mubr.bf16.mxu0 %v1095_v5  ;;  %v1091_v6 = vld [vmem:[#allocation2 + $0x20] sm:$0xff]   ;;  %v1092_v7 = vld [vmem:[#allocation2 + $0x28] sm:$0xff]   ;;  %v520_v9 = vld [vmem:[%s1331_s3 + $0x10] sm:$0xff] }
  0x2d   : > { %1008 = vmatpush3.bf16.msra.mxu0 %v1087_v1  ;;  %v518_v8 = vld [vmem:[%s1331_s3] sm:$0xff]  ;;  %546 = vperm.xlu1 %1086, %v520_v9   ;;  %v519_v10 = vld [vmem:[%s1331_s3 + $0x8] sm:$0xff]  ;;  %v521_v11 = vld [vmem:[%s1331_s3 + $0x18] sm:$0xff]  ;;  %s1343_s11 = smov (!%p281_p2, %s917_s11), 15  ;;  %s1345_s27 = smov (!%p275_p3, %s915_s27), 3 }
  0x2e   : > { %1009 = vmatprep.subr.bf16.mxu0 %v1088_v2  ;;  %536 = vperm.xlu0 %1085, %v518_v8   ;;  %v1093_v12 = vld [vmem:[#allocation2 + $0x30] sm:$0xff]   ;;  %v522_v13 = vld [vmem:[%s1331_s3 + $0x20] sm:$0xff]  ;;  %v523_v14 = vld [vmem:[%s1331_s3 + $0x28] sm:$0xff]  ;;  %s918_s10 = sshll.u32 %s1343_s11, 3  ;;  %s916_s28 = sshll.u32 %s1345_s27, 3 }
  0x2f   : > { %v1094_v15 = vld [vmem:[#allocation2 + $0x38] sm:$0xff]   ;;  %v524_v16 = vld [vmem:[%s1331_s3 + $0x30] sm:$0xff]  ;;  %v1096_v18 = vld [vmem:[%s1329_s1 + $0x8] sm:$0xff]   ;;  %s284_s18 = scalar_lea.vmem %s1332_s4, %s918_s10  ;;  %s1310_s7 = scalar_lea.vmem %s1328_s0, %s916_s28 }
  0x30   : > { %v525_v17 = vld [vmem:[%s1331_s3 + $0x38] sm:$0xff]  ;;  %v526_v19 = vld [vmem:[%s1331_s3 + $0x40] sm:$0xff]  ;;  %v527_v20 = vld [vmem:[%s1331_s3 + $0x48] sm:$0xff]  ;;  %s920_s9 = sshll.u32 %s1343_s11, 2 }
  0x31   : > { %1010 = vmatpush3.bf16.msra.mxu0 %v1088_v2  ;;  %551 = vperm.xlu1 %1086, %v521_v11   ;;  %v1097_v21 = vld [vmem:[%s1329_s1 + $0x10] sm:$0xff]   ;;  %v529_v23 = vld [vmem:[%s1331_s3 + $0x58] sm:$0xff]  ;;  %v530_v25 = vld [vmem:[%s1331_s3 + $0x60] sm:$0xff]  ;;  %s290_s13 = scalar_lea.vmem %s1334_s6, %s920_s9 }
  0x32   : > { %1011 = vmatprep.subr.bf16.mxu0 %v1089_v3  ;;  %541 = vperm.xlu0 %1085, %v519_v10   ;;  %v528_v22 = vld [vmem:[%s1331_s3 + $0x50] sm:$0xff]  ;;  %v1098_v24 = vld [vmem:[%s1329_s1 + $0x18] sm:$0xff]   ;;  %v531_v26 = vld [vmem:[%s1331_s3 + $0x68] sm:$0xff] }
  0x33   : > { %v1099_v27 = vld [vmem:[%s1329_s1 + $0x20] sm:$0xff]   ;;  %v532_v28 = vld [vmem:[%s1331_s3 + $0x70] sm:$0xff]  ;;  %v533_v29 = vld [vmem:[%s1331_s3 + $0x78] sm:$0xff] }
  0x34   : > { %v1100_v30 = vld [vmem:[%s1329_s1 + $0x28] sm:$0xff]   ;;  %v709_v31 = vld [vmem:[%s284_s18] sm:$0xff]  ;;  %v1101_v33 = vld [vmem:[%s1329_s1 + $0x30] sm:$0xff]  }
  0x35   : > { %1012 = vmatpush3.bf16.msra.mxu0 %v1089_v3  ;;  %561 = vperm.xlu1 %1086, %v523_v14   ;;  %v710_v32 = vld [vmem:[%s284_s18 + $0x8] sm:$0xff]  ;;  %v711_v34 = vld [vmem:[%s284_s18 + $0x10] sm:$0xff]  ;;  %v712_v35 = vld [vmem:[%s284_s18 + $0x18] sm:$0xff] }
  0x36   : > { %1013 = vmatprep.subr.bf16.mxu0 %v1090_v4  ;;  %556 = vperm.xlu0 %1085, %v522_v13   ;;  %v1102_v36 = vld [vmem:[%s1329_s1 + $0x38] sm:$0xff]   ;;  %v713_v37 = vld [vmem:[%s284_s18 + $0x20] sm:$0xff]  ;;  %v714_v38 = vld [vmem:[%s284_s18 + $0x28] sm:$0xff] }
  0x37   : > { %v715_v39 = vld [vmem:[%s284_s18 + $0x30] sm:$0xff]  ;;  %v716_v40 = vld [vmem:[%s284_s18 + $0x38] sm:$0xff]  ;;  %v1313_v41 = vld [vmem:[%s1310_s7] sm:$0xff] }
  0x38   : > { %v640_v42 = vunpack.c.l.s8.bf16 %v1313_v41 }
  0x39   : > { %1014 = vmatpush3.bf16.msra.mxu0 %v1090_v4  ;;  %571 = vperm.xlu1 %1086, %v525_v17  }
  0x3a   : > { %1015 = vmatprep.subr.bf16.mxu0 %v1091_v6  ;;  %566 = vperm.xlu0 %1085, %v524_v16  }
  0x3b   : > { %1055 = vmatprep.mubr.bf16.mxu1 %v640_v42 }
  0x3d   : > { %1016 = vmatpush3.bf16.msra.mxu0 %v1091_v6  ;;  %581 = vperm.xlu1 %1086, %v527_v20  }
  0x3e   : > { %1017 = vmatprep.subr.bf16.mxu0 %v1092_v7  ;;  %576 = vperm.xlu0 %1085, %v526_v19  }
  0x41   : > { %1018 = vmatpush3.bf16.msra.mxu0 %v1092_v7  ;;  %591 = vperm.xlu1 %1086, %v529_v23  }
  0x42   : > { %1019 = vmatprep.subr.bf16.mxu0 %v1093_v12  ;;  %586 = vperm.xlu0 %1085, %v528_v22  }
  0x45   : > { %1020 = vmatpush3.bf16.msra.mxu0 %v1093_v12  ;;  %601 = vperm.xlu1 %1086, %v531_v26  }
  0x46   : > { %1021 = vmatprep.subr.bf16.mxu0 %v1094_v15  ;;  %596 = vperm.xlu0 %1085, %v530_v25  }
  0x49   : > { %1022 = vmatpush3.bf16.msra.mxu0 %v1094_v15  ;;  %611 = vperm.xlu1 %1086, %v533_v29  }
  0x4a   : > { %606 = vperm.xlu0 %1085, %v532_v28  }
  0x4c   : > { %1024 = vmatmul.mubr.bf16.vlgmr.msra.gmra.mrb[0].mxu0 %v1096_v18 }
  0x4d   : > { %1027 = vmatprep.mubr.bf16.mxu0 %v1097_v21  ;;  %724 = vperm.xlu1 %1086, %v710_v32  }
  0x4e   : > { %719 = vperm.xlu0 %1085, %v709_v31  }
  0x51   : > { %734 = vperm.xlu1 %1086, %v712_v35   ;;  %v639_v35 = vld [vmem:[%s1310_s7 + $0x8] sm:$0xff] }
  0x52   : > { %729 = vperm.xlu0 %1085, %v711_v34  }
  0x54   : > { %1028 = vmatmul.mubr.bf16.gmra.mrb[4].mxu0 %v1098_v24 }
  0x55   : > { %1031 = vmatprep.mubr.bf16.mxu0 %v1099_v27  ;;  %744 = vperm.xlu1 %1086, %v714_v38   ;;  %v643_v38 = vunpack.c.h.s8.bf16 %v639_v35 }
  0x56   : > { %739 = vperm.xlu0 %1085, %v713_v37   ;;  %v642_v37 = vunpack.c.l.s8.bf16 %v639_v35 }
  0x59   : > { %754 = vperm.xlu1 %1086, %v716_v40  }
  0x5a   : > { %749 = vperm.xlu0 %1085, %v715_v39  }
  0x5c   : > { %1032 = vmatmul.mubr.bf16.gmra.mrb[8].mxu0 %v1100_v30 }
  0x5d   : > { %1035 = vmatprep.mubr.bf16.mxu0 %v1101_v33 }
  0x64   : > { %1036 = vmatmul.mubr.bf16.gmra.mrb[12].mxu0 %v1102_v36  ;;  %v641_v36 = vunpack.c.h.s8.bf16 %v1313_v41 }
  0xac   : > { %v547_v44 = vpop.permute.xlu1 %546 }
  0xad   : > { %v537_v43 = vpop.permute.xlu0 %536 }
  0xb0   : > { %v552_v46 = vpop.permute.xlu1 %551 }
  0xb1   : > { %v542_v45 = vpop.permute.xlu0 %541 }
  0xb4   : > { %v562_v48 = vpop.permute.xlu1 %561 }
  0xb5   : > { %v557_v47 = vpop.permute.xlu0 %556 }
  0xb8   : > { %v572_v52 = vpop.permute.xlu1 %571 }
  0xb9   : > { %v567_v50 = vpop.permute.xlu0 %566 }
  0xbc   : > { %v582_v62 = vpop.permute.xlu1 %581 }
  0xbd   : > { %v577_v61 = vpop.permute.xlu0 %576 }
  0xc0   : > { %v592_v9 = vpop.permute.xlu1 %591 }
  0xc1   : > { %v587_v7 = vpop.permute.xlu0 %586 }
  0xc4   : > { %v602_v18 = vpop.permute.xlu1 %601 }
  0xc5   : > { %v597_v14 = vpop.permute.xlu0 %596 }
  0xc8   : > { %v612_v26 = vpop.permute.xlu1 %611 }
  0xc9   : > { %v607_v24 = vpop.permute.xlu0 %606 }
  0xcc   : > { %v725_v40 = vpop.permute.xlu1 %724 }
  0xcd   : > { %v720_v39 = vpop.permute.xlu0 %719 }
  0xd1   : > { %v730_v42 = vpop.permute.xlu0 %729 }
 0x11f   : > { %v1025_v49 = vpop.f32.mrb[0].mxu0 }
 0x120   : > { %v455_v51 = vpop.f32.mrb[1].mxu0  ;;  %v616_v54 = vmul.f32 %v1025_v49, %v547_v44 }
 0x121   : > { %v1026_v53 = vpop.f32.mrb[2].mxu0  ;;  %v614_v57 = vmul.f32 %v537_v43, %v455_v51  ;;  %v735_v43 = vpop.permute.xlu1 %734 }
 0x122   : > { %v617_v55 = vmul.f32 %v1026_v53, %v552_v46  ;;  %v458_v56 = vpop.f32.mrb[3].mxu0 }
 0x123   : > { %v615_v58 = vmul.f32 %v542_v45, %v458_v56  ;;  %v937_v45 = vld [vmem:[%s1333_s5] ss:$0 sm:$0xff] }
 0x124   : > { %v631_v59 = vpack.c.bf16 %v617_v55, %v616_v54 }
 0x125   : > { %v630_v60 = vpack.c.bf16 %v615_v58, %v614_v57  ;;  %v745_v53 = vpop.permute.xlu1 %744 }
 0x127   : > { %v1029_v63 = vpop.f32.mrb[4].mxu0  ;;  %1039 = vmatprep.subr.bf16.mxu1 %v630_v60 }
 0x128   : > { %v471_v0 = vpop.f32.mrb[5].mxu0  ;;  %1040 = vmatpush3.bf16.msra.mxu1 %v630_v60  ;;  %v620_v2 = vmul.f32 %v1029_v63, %v567_v50 }
 0x129   : > { %v1030_v1 = vpop.f32.mrb[6].mxu0  ;;  %1041 = vmatprep.subr.bf16.mxu1 %v631_v59  ;;  %v618_v5 = vmul.f32 %v557_v47, %v471_v0 }
 0x12a   : > { %v621_v3 = vmul.f32 %v1030_v1, %v572_v52  ;;  %v474_v4 = vpop.f32.mrb[7].mxu0 }
 0x12b   : > { %v619_v6 = vmul.f32 %v562_v48, %v474_v4  ;;  %v740_v48 = vpop.permute.xlu0 %739 }
 0x12c   : > { %v633_v8 = vpack.c.bf16 %v621_v3, %v620_v2  ;;  %1042 = vmatpush3.bf16.msra.mxu1 %v631_v59  ;;  %v755_v3 = vpop.permute.xlu1 %754 }
 0x12d   : > { %v632_v10 = vpack.c.bf16 %v619_v6, %v618_v5 }
 0x12f   : > { %v1033_v11 = vpop.f32.mrb[8].mxu0  ;;  %1043 = vmatprep.subr.bf16.mxu1 %v632_v10  ;;  %v750_v60 = vpop.permute.xlu0 %749 }
 0x130   : > { %v487_v12 = vpop.f32.mrb[9].mxu0  ;;  %1044 = vmatpush3.bf16.msra.mxu1 %v632_v10  ;;  %v624_v15 = vmul.f32 %v1033_v11, %v587_v7 }
 0x131   : > { %v1034_v13 = vpop.f32.mrb[10].mxu0  ;;  %1045 = vmatprep.subr.bf16.mxu1 %v633_v8  ;;  %v622_v19 = vmul.f32 %v577_v61, %v487_v12 }
 0x132   : > { %v625_v16 = vmul.f32 %v1034_v13, %v592_v9  ;;  %v490_v17 = vpop.f32.mrb[11].mxu0 }
 0x133   : > { %v623_v20 = vmul.f32 %v582_v62, %v490_v17 }
 0x134   : > { %v635_v21 = vpack.c.bf16 %v625_v16, %v624_v15  ;;  %1046 = vmatpush3.bf16.msra.mxu1 %v633_v8 }
 0x135   : > { %v634_v22 = vpack.c.bf16 %v623_v20, %v622_v19 }
 0x137   : > { %v1037_v23 = vpop.f32.mrb[12].mxu0  ;;  %1047 = vmatprep.subr.bf16.mxu1 %v634_v22 }
 0x138   : > { %v503_v25 = vpop.f32.mrb[13].mxu0  ;;  %1048 = vmatpush3.bf16.msra.mxu1 %v634_v22  ;;  %v628_v28 = vmul.f32 %v1037_v23, %v607_v24 }
 0x139   : > { %v1038_v27 = vpop.f32.mrb[14].mxu0  ;;  %1049 = vmatprep.subr.bf16.mxu1 %v635_v21  ;;  %v626_v31 = vmul.f32 %v597_v14, %v503_v25 }
 0x13a   : > { %v629_v29 = vmul.f32 %v1038_v27, %v612_v26  ;;  %v506_v30 = vpop.f32.mrb[15].mxu0 }
 0x13b   : > { %v627_v32 = vmul.f32 %v602_v18, %v506_v30 }
 0x13c   : > { %v637_v33 = vpack.c.bf16 %v629_v29, %v628_v28  ;;  %1050 = vmatpush3.bf16.msra.mxu1 %v635_v21 }
 0x13d   : > { %v636_v34 = vpack.c.bf16 %v627_v32, %v626_v31 }
 0x13f   : > { %1051 = vmatprep.subr.bf16.mxu1 %v636_v34 }
 0x140   : > { %1052 = vmatpush3.bf16.msra.mxu1 %v636_v34 }
 0x141   : > { %1053 = vmatprep.subr.bf16.mxu1 %v637_v33 }
 0x144   : > { %1054 = vmatpush3.bf16.msra.mxu1 %v637_v33 }
 0x147   : > { %1056 = vmatmul.mubr.bf16.vlgmr.msra.gmra.mrb[0].mxu1 %v641_v36 }
 0x148   : > { %1059 = vmatprep.mubr.bf16.mxu1 %v642_v37 }
 0x14f   : > { %1060 = vmatmul.mubr.bf16.gmra.mrb[4].mxu1 %v643_v38 }
 0x21a   : > { %v1057_v44 = vpop.f32.mrb[0].mxu1 }
 0x21b   : > { %v759_v46 = vmul.f32 %v1057_v44, %v730_v42  ;;  %v678_v47 = vpop.f32.mrb[1].mxu1 }
 0x21c   : > { %v757_v41 = vmul.f32 %v720_v39, %v678_v47  ;;  %v1058_v49 = vpop.f32.mrb[2].mxu1 }
 0x21d   : > { %v774_v50 = vadd.f32 %v937_v45, %v759_v46  ;;  %v760_v51 = vmul.f32 %v1058_v49, %v735_v43  ;;  %v681_v52 = vpop.f32.mrb[3].mxu1 }
 0x21e   : > { %v772_v54 = vadd.f32 %v937_v45, %v757_v41  ;;  %v758_v55 = vmul.f32 %v725_v40, %v681_v52 }
 0x21f   : > { %v775_v56 = vadd.f32 %v937_v45, %v760_v51  ;;  %v782_v58 = vmax.f32 %v774_v50, 0.0 }
 0x220   : > { %v773_v57 = vadd.f32 %v937_v45, %v758_v55  ;;  %v780_v61 = vmax.f32 %v772_v54, 0.0 }
 0x221   : > { %v783_v59 = vmax.f32 %v775_v56, 0.0 }
 0x222   : > { %v781_v62 = vmax.f32 %v773_v57, 0.0  ;;  %v1061_v63 = vpop.f32.mrb[4].mxu1 }
 0x223   : > { %v964_v0 = vpack.c.bf16 %v783_v59, %v782_v58  ;;  %v763_v1 = vmul.f32 %v1061_v63, %v750_v60  ;;  %v694_v2 = vpop.f32.mrb[5].mxu1 }
 0x224   : > { %v959_v4 = vpack.c.bf16 %v781_v62, %v780_v61  ;;  %v761_v5 = vmul.f32 %v740_v48, %v694_v2  ;;  %v1062_v6 = vpop.f32.mrb[6].mxu1 }
 0x225   : > { %976 = vst [vmem:[%s290_s13 + $0x8] sm:$0xff] %v964_v0   ;;  %v778_v7 = vadd.f32 %v937_v45, %v763_v1  ;;  %v764_v8 = vmul.f32 %v1062_v6, %v755_v3  ;;  %v697_v9 = vpop.f32.mrb[7].mxu1 }
 0x226   : > { %960 = vst [vmem:[%s290_s13] sm:$0xff] %v959_v4   ;;  %v776_v10 = vadd.f32 %v937_v45, %v761_v5  ;;  %v762_v11 = vmul.f32 %v745_v53, %v697_v9 }
 0x227   : > { %v779_v12 = vadd.f32 %v937_v45, %v764_v8  ;;  %v786_v14 = vmax.f32 %v778_v7, 0.0 }
 0x228   : > { %v777_v13 = vadd.f32 %v937_v45, %v762_v11  ;;  %v784_v16 = vmax.f32 %v776_v10, 0.0 }
 0x229   : > { %v787_v15 = vmax.f32 %v779_v12, 0.0 }
 0x22a   : > { %v785_v17 = vmax.f32 %v777_v13, 0.0 }
 0x22b   : > { %v974_v18 = vpack.c.bf16 %v787_v15, %v786_v14 }
 0x22c   : > { %v969_v19 = vpack.c.bf16 %v785_v17, %v784_v16 }
 0x22d   : > { %978 = vst [vmem:[%s290_s13 + $0x18] sm:$0xff] %v974_v18  }
 0x22e   : > { %977 = vst [vmem:[%s290_s13 + $0x10] sm:$0xff] %v969_v19  }
 0x22f PF: > { %s17_s21 = sadd.s32 1, %s1141_s21  }
 0x230   : > { %p14_p5 = scmp.ge.s32.totalorder %s17_s21, 4  }
 0x232   :  { %16 = sbr.rel (!%p14_p5) target bundleno = 1 (0x1), region = 82 }
 0x239   :  { %850 = vsyncpa [#allocation3], 1 }
 0x23a   :  { %852 = vsyncpa [#allocation3 + $0x1], 1 }

</bundles_post_ra>
